<compile_context>
chip_gen: v7x
topology: tpu7x:2x2x1
jax: 0.10.0
libtpu: 0.0.40
codegen_flags: <defaults>
</compile_context>

<pallas_src>
import numpy as np
import jax
import jax.numpy as jnp
from jax.experimental import pallas as pl
from jax.experimental.pallas import tpu as pltpu

LRELU_SLOPE = 0.2
BN_EPS = 1e-5
LANE = 128


def _round_up(x, m):
    return (x + m - 1) // m * m


def _vmem_limit(need_bytes):
    """Per-call VMEM limit: floor 32 MiB (fixes v5e's 16 MiB scoped default),
    cap at physical VMEM minus ~16 MiB headroom (~48 MiB v7x, ~112 MiB v6e)."""
    cap = 48 * 2**20
    try:
        cap = max(32 * 2**20,
                  int(pltpu.get_tpu_info().vmem_capacity_bytes) - 16 * 2**20)
    except Exception:
        pass
    return int(min(cap, max(32 * 2**20, 2 * int(need_bytes))))


def _compiler_params(need_bytes):
    return pltpu.CompilerParams(
        dimension_semantics=("parallel", "parallel"),
        vmem_limit_bytes=_vmem_limit(need_bytes))


def _pick_tile_h(H, W, K, C_pad, k, N):
    """Largest divisor TH of H whose per-tile working set (bf16 halo slab +
    f32 output block, double-buffered) stays under ~8 MiB; then split once
    more if the grid would otherwise be a single step (v7x has 2 TCs)."""
    divisors = [d for d in range(H, 0, -1) if H % d == 0]

    def per_tile_bytes(th):
        slab = (th + k - 1) * W * K * 2          # bf16 input slab
        outb = th * W * C_pad * 4                # f32 output block
        return 2 * (slab + outb)                 # double-buffered

    budget = 8 * 2**20
    fitting = [d for d in divisors if per_tile_bytes(d) <= budget] or [1]
    th = fitting[0]
    if N * (H // th) < 2:                        # keep >= 2 grid steps if we can
        for d in fitting:
            if H // d >= 2:
                th = d
                break
    return th


def init_cno_block_params(key, in_channels, out_channels, conv_kernel=3,
                          intermediate=128):
    kw_, kb_, k1, k2 = jax.random.split(key, 4)
    fan_in = in_channels * conv_kernel * conv_kernel
    bound = 1.0 / np.sqrt(fan_in)
    return {
        # Conv2d default (kaiming-uniform-like) init, deterministic via PRNGKey.
        "conv_w": jax.random.uniform(
            kw_, (out_channels, in_channels, conv_kernel, conv_kernel),
            jnp.float32, -bound, bound),
        "conv_b": jax.random.uniform(kb_, (out_channels,), jnp.float32,
                                     -bound, bound),
        # BatchNorm2d default affine params.
        "bn_gamma": jnp.ones((out_channels,), jnp.float32),
        "bn_beta": jnp.zeros((out_channels,), jnp.float32),
        # FILM parameters, exactly as FILM.__init__ fills them.
        "film_s_w1": jnp.zeros((intermediate, 1), jnp.float32),
        "film_s_b1": jax.random.uniform(k1, (intermediate,), jnp.float32, -1., 1.),
        "film_s_w2": jnp.zeros((out_channels, intermediate), jnp.float32),
        "film_s_b2": jnp.ones((out_channels,), jnp.float32),
        "film_b_w1": jnp.zeros((intermediate, 1), jnp.float32),
        "film_b_b1": jax.random.uniform(k2, (intermediate,), jnp.float32, -1., 1.),
        "film_b_w2": jnp.zeros((out_channels, intermediate), jnp.float32),
        "film_b_b2": jnp.zeros((out_channels,), jnp.float32),
    }


def cno_block_forward(params, x, time, scaling=1.0, *, is_time=4,
                      conv_kernel=3, nchw_output=True):
    """x: (N, C_in, H, W) NCHW (PyTorch convention) -> (N, C_out, H, W).
    Set nchw_output=False to keep NHWC and skip one full HBM transpose pass."""
    del scaling  # only consumed by the (unprovided) anti-aliased CNO LReLU
    assert conv_kernel % 2 == 1, "SAME halo conv implemented for odd kernels"
    k = conv_kernel
    N, Cin, H, W = x.shape
    Cout = params["conv_w"].shape[0]
    C_pad = _round_up(Cout, LANE)
    K = k * Cin                       # per-row-tap contraction depth
    pad = (k - 1) // 2

    TH = _pick_tile_h(H, W, K, C_pad, k, N)
    T = H // TH
    G = N * T
    RT = TH * W                       # output rows per tile
    SR = (TH + k - 1) * W             # slab rows per tile (incl. halo)
    M_true = N * H * W

    f32, bf16 = jnp.float32, jnp.bfloat16

    # ---- W-tap, row-halo slabs (bf16) ---------------------------------------
    # slab[n*T+i, hs*W + w, kw*Cin + ci] = x_pad[n, i*TH + hs, w + kw, ci]
    xh = jnp.transpose(x, (0, 2, 3, 1)).astype(bf16)               # NHWC
    xp = jnp.pad(xh, ((0, 0), (pad, pad), (pad, pad), (0, 0)))
    wt = jnp.concatenate([xp[:, :, kw:kw + W, :] for kw in range(k)], axis=-1)
    if T == 1:
        slabs = wt.reshape(G, SR, K)
    else:
        slabs = jnp.stack(
            [wt[:, i * TH:i * TH + TH + k - 1] for i in range(T)],
            axis=1).reshape(G, SR, K)

    # ---- conv weights: (k, k*Cin, C_pad) bf16, feature order (kw, ci) --------
    wk = jnp.transpose(params["conv_w"], (2, 3, 1, 0)).reshape(k, K, Cout)
    wk = jnp.pad(wk, ((0, 0), (0, 0), (0, C_pad - Cout))).astype(bf16)

    # ---- kernels (closures over the static tile geometry) -------------------
    def conv_tile(x_ref, w_ref):
        """Halo conv on one row tile: k shifted bf16 MXU matmuls, f32 accum."""
        acc = jnp.dot(x_ref[0, 0:RT, :], w_ref[0],
                      preferred_element_type=jnp.float32)
        for kh in range(1, k):
            acc = acc + jnp.dot(x_ref[0, kh * W:kh * W + RT, :], w_ref[kh],
                                preferred_element_type=jnp.float32)
        return acc

    def conv_stats_kernel(x_ref, w_ref, s_ref, ss_ref):
        # BN pass 1: stats only -- no (M, C_pad) activation is materialized.
        # Conv bias is omitted on purpose: BN mean subtraction cancels it.
        acc = conv_tile(x_ref, w_ref)
        s_ref[0] = jnp.sum(acc, axis=0, keepdims=True)
        ss_ref[0] = jnp.sum(acc * acc, axis=0, keepdims=True)

    def conv_bn_act_kernel(x_ref, w_ref, sc_ref, sh_ref, o_ref):
        # BN pass 2: recompute the conv (cheaper than an activation round-trip
        # since k*Cin << C_pad), folded BN affine, LeakyReLU.
        acc = conv_tile(x_ref, w_ref)
        y = acc * sc_ref[...] + sh_ref[...]
        o_ref[0] = jnp.where(y >= 0.0, y, LRELU_SLOPE * y)

    def conv_film_act_kernel(x_ref, w_ref, fs_ref, fb_ref, o_ref):
        # FILM path: conv + per-sample scale/bias (conv bias folded in), LReLU.
        acc = conv_tile(x_ref, w_ref)
        y = acc * fs_ref[0] + fb_ref[0]
        o_ref[0] = jnp.where(y >= 0.0, y, LRELU_SLOPE * y)

    slab_spec = pl.BlockSpec((1, SR, K), lambda n, t: (n * T + t, 0, 0))
    # TODO(synk): pipeline_mode=pl.Buffered(1) on w_spec / a K ("arbitrary")
    # grid axis would drop the duplicate weight buffer; only matters for very
    # large Cin, the TH budget already bounds per-step VMEM here.
    w_spec = pl.BlockSpec((k, K, C_pad), lambda n, t: (0, 0, 0))
    out_spec = pl.BlockSpec((1, RT, C_pad), lambda n, t: (n * T + t, 0, 0))

    slab_bytes = G * SR * K * 2
    w_bytes = k * K * C_pad * 2
    out_bytes = G * RT * C_pad * 4
    mm_flops = 2 * G * k * RT * K * C_pad
    need = 2 * (SR * K * 2 + RT * C_pad * 4) + 2 * w_bytes + 8 * C_pad * 4

    use_film = (is_time == 1) or (is_time is True)

    if not use_film:
        # -- pass 1: per-tile channel sum / sum-of-squares --------------------
        stat_shape = jax.ShapeDtypeStruct((G, 1, C_pad), f32)
        stat_spec = pl.BlockSpec((1, 1, C_pad), lambda n, t: (n * T + t, 0, 0))
        s, ss = pl.pallas_call(
            conv_stats_kernel,
            out_shape=(stat_shape, stat_shape),
            grid=(N, T),
            in_specs=[slab_spec, w_spec],
            out_specs=(stat_spec, stat_spec),
            compiler_params=_compiler_params(need),
            cost_estimate=pl.CostEstimate(
                flops=mm_flops, transcendentals=0,
                bytes_accessed=slab_bytes + w_bytes + 2 * G * C_pad * 4),
        )(slabs, wk)

        # Tiny per-channel reduction; fold BN affine into one scale/shift.
        tot_sum = jnp.sum(s, axis=(0, 1))
        tot_ssq = jnp.sum(ss, axis=(0, 1))
        mean = tot_sum / M_true
        # TODO(synk): E[y^2]-mean^2 in f32 can cancel for strongly offset
        # activations; a Welford-style accumulation would be safer.
        var = jnp.maximum(tot_ssq / M_true - mean * mean, 0.0)
        gamma = jnp.pad(params["bn_gamma"], (0, C_pad - Cout))
        beta = jnp.pad(params["bn_beta"], (0, C_pad - Cout))
        sc = (gamma * jax.lax.rsqrt(var + BN_EPS)).reshape(1, C_pad)
        sh = (beta - mean * sc[0]).reshape(1, C_pad)

        # -- pass 2: recompute conv, folded BN affine, LeakyReLU --------------
        out3d = pl.pallas_call(
            conv_bn_act_kernel,
            out_shape=jax.ShapeDtypeStruct((G, RT, C_pad), f32),
            grid=(N, T),
            in_specs=[slab_spec, w_spec,
                      pl.BlockSpec((1, C_pad), lambda n, t: (0, 0)),
                      pl.BlockSpec((1, C_pad), lambda n, t: (0, 0))],
            out_specs=out_spec,
            compiler_params=_compiler_params(need),
            cost_estimate=pl.CostEstimate(
                flops=mm_flops + 3 * G * RT * C_pad, transcendentals=0,
                bytes_accessed=slab_bytes + w_bytes + out_bytes),
        )(slabs, wk, sc, sh)
    else:
        # FILM's tiny 1->intermediate->C MLPs (parameter-side glue; FILM norm
        # is Identity for nl_dim=[0]).  Per-sample scale/bias as (N,1,C_pad)
        # blocks; conv bias folded into the FILM bias.
        t_in = jnp.reshape(time, (-1, 1)).astype(f32)                 # (N, 1)
        lat_s = t_in @ params["film_s_w1"].T + params["film_s_b1"]
        scale = lat_s @ params["film_s_w2"].T + params["film_s_b2"]   # (N, Cout)
        lat_b = t_in @ params["film_b_w1"].T + params["film_b_b1"]
        fbias = lat_b @ params["film_b_w2"].T + params["film_b_b2"]   # (N, Cout)
        fbias = fbias + params["conv_b"][None, :] * scale             # fold bias
        scale = jnp.pad(scale, ((0, 0), (0, C_pad - Cout)))[:, None, :]
        fbias = jnp.pad(fbias, ((0, 0), (0, C_pad - Cout)))[:, None, :]

        film_spec = pl.BlockSpec((1, 1, C_pad), lambda n, t: (n, 0, 0))
        out3d = pl.pallas_call(
            conv_film_act_kernel,
            out_shape=jax.ShapeDtypeStruct((G, RT, C_pad), f32),
            grid=(N, T),
            in_specs=[slab_spec, w_spec, film_spec, film_spec],
            out_specs=out_spec,
            compiler_params=_compiler_params(need),
            cost_estimate=pl.CostEstimate(
                flops=mm_flops + 3 * G * RT * C_pad, transcendentals=0,
                bytes_accessed=slab_bytes + w_bytes + out_bytes),
        )(slabs, wk, scale, fbias)

    out = out3d.reshape(N, H, W, C_pad)[..., :Cout]
    if nchw_output:
        out = jnp.transpose(out, (0, 3, 1, 2))      # NCHW, PyTorch parity
    return out


# --------------------------- pure-JAX reference -----------------------------
def _reference_forward(params, x, time=None, is_time=4):
    y = jax.lax.conv_general_dilated(
        x, params["conv_w"], (1, 1), "SAME",
        dimension_numbers=("NCHW", "OIHW", "NCHW"))
    y = y + params["conv_b"][None, :, None, None]
    if (is_time == 1) or (is_time is True):
        t = jnp.reshape(time, (-1, 1)).astype(x.dtype)
        lat_s = t @ params["film_s_w1"].T + params["film_s_b1"]
        scale = lat_s @ params["film_s_w2"].T + params["film_s_b2"]
        lat_b = t @ params["film_b_w1"].T + params["film_b_b1"]
        fbias = lat_b @ params["film_b_w2"].T + params["film_b_b2"]
        y = y * scale[:, :, None, None] + fbias[:, :, None, None]
    else:
        mean = y.mean(axis=(0, 2, 3), keepdims=True)
        var = ((y - mean) ** 2).mean(axis=(0, 2, 3), keepdims=True)
        y = (y - mean) / jnp.sqrt(var + BN_EPS)
        y = y * params["bn_gamma"][None, :, None, None] + \
            params["bn_beta"][None, :, None, None]
    return jnp.where(y >= 0.0, y, LRELU_SLOPE * y)


# ---------------------------------- main -------------------------------------
if __name__ == "__main__":
    key = jax.random.PRNGKey(0)
    kx, kt, kp, kf1, kf2 = jax.random.split(key, 5)

    N, Cin, Cout, S = 2, 4, 4, 16          # in_size == out_size == 16
    x = jax.random.normal(kx, (N, Cin, S, S), jnp.float32)
    time = jax.random.uniform(kt, (N,), jnp.float32)
    params = init_cno_block_params(kp, Cin, Cout)

    # bf16 MXU operands (f32 accumulation) -> compare at bf16-level tolerance.
    TOL = dict(rtol=2e-2, atol=2e-2)

    fwd_bn = jax.jit(lambda p, xx, tt: cno_block_forward(p, xx, tt))
    fwd_film = jax.jit(lambda p, xx, tt: cno_block_forward(p, xx, tt, is_time=1))

    # Default CNOBlock config (is_time=4, batch_norm=True): conv -> BN -> LReLU.
    y = jax.block_until_ready(fwd_bn(params, x, time))
    ref = _reference_forward(params, x)
    np.testing.assert_allclose(np.asarray(y), np.asarray(ref), **TOL)

    # is_time==1 branch (FILM conditioning, no batchnorm).  Use non-trivial FILM
    # output-layer weights so the scale/bias actually depend on `time`.
    params_f = dict(params)
    params_f["film_s_w2"] = 0.1 * jax.random.normal(
        kf1, params["film_s_w2"].shape, jnp.float32)
    params_f["film_b_w2"] = 0.1 * jax.random.normal(
        kf2, params["film_b_w2"].shape, jnp.float32)
    y2 = jax.block_until_ready(fwd_film(params_f, x, time))
    ref2 = _reference_forward(params_f, x, time, is_time=1)
    np.testing.assert_allclose(np.asarray(y2), np.asarray(ref2), **TOL)

    print("KERNEL_OK")
</pallas_src>

<mosaic_0001>
module attributes {stable_mosaic.version = 11 : i64} {
  func.func @conv_stats_kernel(%arg0: i32, %arg1: i32, %arg2: memref<1x288x12xbf16, #tpu.memory_space<vmem>>, %arg3: memref<3x12x128xbf16, #tpu.memory_space<vmem>>, %arg4: memref<1x1x128xf32, #tpu.memory_space<vmem>>, %arg5: memref<1x1x128xf32, #tpu.memory_space<vmem>>) attributes {dimension_semantics = [#tpu.dimension_semantics<parallel>, #tpu.dimension_semantics<parallel>], iteration_bounds = array<i64: 2, 1>, scalar_prefetch = 0 : i64, scratch_operands = 0 : i64, tpu.core_type = #tpu.core_type<tc>, window_params = [{transform_indices = @transform_0, window_bounds = array<i64: 1, 288, 12>}, {pipeline_mode = #tpu.pipeline_mode<synchronous>, transform_indices = @transform_1, window_bounds = array<i64: 3, 12, 128>}, {transform_indices = @transform_2, window_bounds = array<i64: 1, 1, 128>}, {transform_indices = @transform_3, window_bounds = array<i64: 1, 1, 128>}]} {
    %c0 = arith.constant 0 : index
    %c0_0 = arith.constant 0 : index
    %c0_1 = arith.constant 0 : index
    %0 = vector.load %arg2[%c0, %c0_0, %c0_1] : memref<1x288x12xbf16, #tpu.memory_space<vmem>>, vector<1x256x12xbf16>
    %1 = vector.shape_cast %0 : vector<1x256x12xbf16> to vector<256x12xbf16>
    %c0_2 = arith.constant 0 : index
    %c0_3 = arith.constant 0 : index
    %c0_4 = arith.constant 0 : index
    %2 = vector.load %arg3[%c0_2, %c0_3, %c0_4] : memref<3x12x128xbf16, #tpu.memory_space<vmem>>, vector<1x12x128xbf16>
    %3 = vector.shape_cast %2 : vector<1x12x128xbf16> to vector<12x128xbf16>
    %cst = arith.constant dense<0.000000e+00> : vector<256x128xf32>
    %4 = tpu.matmul %1, %3, %cst {dimension_numbers = #tpu.dot_dimension_numbers<[1], [0], [0], [1], [0, 0, 1, 1], [], []>} : vector<256x12xbf16>, vector<12x128xbf16>, vector<256x128xf32> -> vector<256x128xf32>
    %c0_5 = arith.constant 0 : index
    %c16 = arith.constant 16 : index
    %c0_6 = arith.constant 0 : index
    %5 = vector.load %arg2[%c0_5, %c16, %c0_6] : memref<1x288x12xbf16, #tpu.memory_space<vmem>>, vector<1x256x12xbf16>
    %6 = vector.shape_cast %5 : vector<1x256x12xbf16> to vector<256x12xbf16>
    %c1 = arith.constant 1 : index
    %c0_7 = arith.constant 0 : index
    %c0_8 = arith.constant 0 : index
    %7 = vector.load %arg3[%c1, %c0_7, %c0_8] : memref<3x12x128xbf16, #tpu.memory_space<vmem>>, vector<1x12x128xbf16>
    %8 = vector.shape_cast %7 : vector<1x12x128xbf16> to vector<12x128xbf16>
    %cst_9 = arith.constant dense<0.000000e+00> : vector<256x128xf32>
    %9 = tpu.matmul %6, %8, %cst_9 {dimension_numbers = #tpu.dot_dimension_numbers<[1], [0], [0], [1], [0, 0, 1, 1], [], []>} : vector<256x12xbf16>, vector<12x128xbf16>, vector<256x128xf32> -> vector<256x128xf32>
    %10 = arith.addf %4, %9 : vector<256x128xf32>
    %c0_10 = arith.constant 0 : index
    %c32 = arith.constant 32 : index
    %c0_11 = arith.constant 0 : index
    %11 = vector.load %arg2[%c0_10, %c32, %c0_11] : memref<1x288x12xbf16, #tpu.memory_space<vmem>>, vector<1x256x12xbf16>
    %12 = vector.shape_cast %11 : vector<1x256x12xbf16> to vector<256x12xbf16>
    %c2 = arith.constant 2 : index
    %c0_12 = arith.constant 0 : index
    %c0_13 = arith.constant 0 : index
    %13 = vector.load %arg3[%c2, %c0_12, %c0_13] : memref<3x12x128xbf16, #tpu.memory_space<vmem>>, vector<1x12x128xbf16>
    %14 = vector.shape_cast %13 : vector<1x12x128xbf16> to vector<12x128xbf16>
    %cst_14 = arith.constant dense<0.000000e+00> : vector<256x128xf32>
    %15 = tpu.matmul %12, %14, %cst_14 {dimension_numbers = #tpu.dot_dimension_numbers<[1], [0], [0], [1], [0, 0, 1, 1], [], []>} : vector<256x12xbf16>, vector<12x128xbf16>, vector<256x128xf32> -> vector<256x128xf32>
    %16 = arith.addf %10, %15 : vector<256x128xf32>
    %cst_15 = arith.constant dense<0.000000e+00> : vector<128xf32>
    %17 = vector.multi_reduction <add>, %16, %cst_15 [0] : vector<256x128xf32> to vector<128xf32>
    %18 = vector.shape_cast %17 : vector<128xf32> to vector<1x128xf32>
    %c0_16 = arith.constant 0 : index
    %c0_17 = arith.constant 0 : index
    %c0_18 = arith.constant 0 : index
    %19 = vector.load %arg4[%c0_16, %c0_17, %c0_18] : memref<1x1x128xf32, #tpu.memory_space<vmem>>, vector<1x1x128xf32>
    %20 = vector.shape_cast %19 : vector<1x1x128xf32> to vector<1x128xf32>
    %21 = vector.shape_cast %18 : vector<1x128xf32> to vector<1x1x128xf32>
    tpu.vector_store %arg4[%c0_16, %c0_17, %c0_18], %21 {strides = array<i32>} : memref<1x1x128xf32, #tpu.memory_space<vmem>>, vector<1x1x128xf32>,
    %22 = arith.mulf %16, %16 : vector<256x128xf32>
    %cst_19 = arith.constant dense<0.000000e+00> : vector<128xf32>
    %23 = vector.multi_reduction <add>, %22, %cst_19 [0] : vector<256x128xf32> to vector<128xf32>
    %24 = vector.shape_cast %23 : vector<128xf32> to vector<1x128xf32>
    %c0_20 = arith.constant 0 : index
    %c0_21 = arith.constant 0 : index
    %c0_22 = arith.constant 0 : index
    %25 = vector.load %arg5[%c0_20, %c0_21, %c0_22] : memref<1x1x128xf32, #tpu.memory_space<vmem>>, vector<1x1x128xf32>
    %26 = vector.shape_cast %25 : vector<1x1x128xf32> to vector<1x128xf32>
    %27 = vector.shape_cast %24 : vector<1x128xf32> to vector<1x1x128xf32>
    tpu.vector_store %arg5[%c0_20, %c0_21, %c0_22], %27 {strides = array<i32>} : memref<1x1x128xf32, #tpu.memory_space<vmem>>, vector<1x1x128xf32>,
    return
  }
  func.func @transform_0(%arg0: i32, %arg1: i32) -> (i32, i32, i32) {
    %c1_i32 = arith.constant 1 : i32
    %0 = arith.muli %arg0, %c1_i32 : i32
    %1 = arith.addi %0, %arg1 : i32
    %c0_i32 = arith.constant 0 : i32
    %c0_i32_0 = arith.constant 0 : i32
    %c0_i32_1 = arith.constant 0 : i32
    return %1, %c0_i32, %c0_i32_0 : i32, i32, i32
  }
  func.func @transform_1(%arg0: i32, %arg1: i32) -> (i32, i32, i32) {
    %c0_i32 = arith.constant 0 : i32
    %c0_i32_0 = arith.constant 0 : i32
    %c0_i32_1 = arith.constant 0 : i32
    %c0_i32_2 = arith.constant 0 : i32
    return %c0_i32, %c0_i32_0, %c0_i32_1 : i32, i32, i32
  }
  func.func @transform_2(%arg0: i32, %arg1: i32) -> (i32, i32, i32) {
    %c1_i32 = arith.constant 1 : i32
    %0 = arith.muli %arg0, %c1_i32 : i32
    %1 = arith.addi %0, %arg1 : i32
    %c0_i32 = arith.constant 0 : i32
    %c0_i32_0 = arith.constant 0 : i32
    %c0_i32_1 = arith.constant 0 : i32
    return %1, %c0_i32, %c0_i32_0 : i32, i32, i32
  }
  func.func @transform_3(%arg0: i32, %arg1: i32) -> (i32, i32, i32) {
    %c1_i32 = arith.constant 1 : i32
    %0 = arith.muli %arg0, %c1_i32 : i32
    %1 = arith.addi %0, %arg1 : i32
    %c0_i32 = arith.constant 0 : i32
    %c0_i32_0 = arith.constant 0 : i32
    %c0_i32_1 = arith.constant 0 : i32
    return %1, %c0_i32, %c0_i32_0 : i32, i32, i32
  }
}

module attributes {stable_mosaic.version = 11 : i64} {
  func.func @conv_bn_act_kernel(%arg0: i32, %arg1: i32, %arg2: memref<1x288x12xbf16, #tpu.memory_space<vmem>>, %arg3: memref<3x12x128xbf16, #tpu.memory_space<vmem>>, %arg4: memref<1x128xf32, #tpu.memory_space<vmem>>, %arg5: memref<1x128xf32, #tpu.memory_space<vmem>>, %arg6: memref<1x256x128xf32, #tpu.memory_space<vmem>>) attributes {dimension_semantics = [#tpu.dimension_semantics<parallel>, #tpu.dimension_semantics<parallel>], iteration_bounds = array<i64: 2, 1>, scalar_prefetch = 0 : i64, scratch_operands = 0 : i64, tpu.core_type = #tpu.core_type<tc>, window_params = [{transform_indices = @transform_0, window_bounds = array<i64: 1, 288, 12>}, {pipeline_mode = #tpu.pipeline_mode<synchronous>, transform_indices = @transform_1, window_bounds = array<i64: 3, 12, 128>}, {pipeline_mode = #tpu.pipeline_mode<synchronous>, transform_indices = @transform_2, window_bounds = array<i64: 1, 128>}, {pipeline_mode = #tpu.pipeline_mode<synchronous>, transform_indices = @transform_3, window_bounds = array<i64: 1, 128>}, {transform_indices = @transform_4, window_bounds = array<i64: 1, 256, 128>}]} {
    %c0 = arith.constant 0 : index
    %c0_0 = arith.constant 0 : index
    %c0_1 = arith.constant 0 : index
    %0 = vector.load %arg2[%c0, %c0_0, %c0_1] : memref<1x288x12xbf16, #tpu.memory_space<vmem>>, vector<1x256x12xbf16>
    %1 = vector.shape_cast %0 : vector<1x256x12xbf16> to vector<256x12xbf16>
    %c0_2 = arith.constant 0 : index
    %c0_3 = arith.constant 0 : index
    %c0_4 = arith.constant 0 : index
    %2 = vector.load %arg3[%c0_2, %c0_3, %c0_4] : memref<3x12x128xbf16, #tpu.memory_space<vmem>>, vector<1x12x128xbf16>
    %3 = vector.shape_cast %2 : vector<1x12x128xbf16> to vector<12x128xbf16>
    %cst = arith.constant dense<0.000000e+00> : vector<256x128xf32>
    %4 = tpu.matmul %1, %3, %cst {dimension_numbers = #tpu.dot_dimension_numbers<[1], [0], [0], [1], [0, 0, 1, 1], [], []>} : vector<256x12xbf16>, vector<12x128xbf16>, vector<256x128xf32> -> vector<256x128xf32>
    %c0_5 = arith.constant 0 : index
    %c16 = arith.constant 16 : index
    %c0_6 = arith.constant 0 : index
    %5 = vector.load %arg2[%c0_5, %c16, %c0_6] : memref<1x288x12xbf16, #tpu.memory_space<vmem>>, vector<1x256x12xbf16>
    %6 = vector.shape_cast %5 : vector<1x256x12xbf16> to vector<256x12xbf16>
    %c1 = arith.constant 1 : index
    %c0_7 = arith.constant 0 : index
    %c0_8 = arith.constant 0 : index
    %7 = vector.load %arg3[%c1, %c0_7, %c0_8] : memref<3x12x128xbf16, #tpu.memory_space<vmem>>, vector<1x12x128xbf16>
    %8 = vector.shape_cast %7 : vector<1x12x128xbf16> to vector<12x128xbf16>
    %cst_9 = arith.constant dense<0.000000e+00> : vector<256x128xf32>
    %9 = tpu.matmul %6, %8, %cst_9 {dimension_numbers = #tpu.dot_dimension_numbers<[1], [0], [0], [1], [0, 0, 1, 1], [], []>} : vector<256x12xbf16>, vector<12x128xbf16>, vector<256x128xf32> -> vector<256x128xf32>
    %10 = arith.addf %4, %9 : vector<256x128xf32>
    %c0_10 = arith.constant 0 : index
    %c32 = arith.constant 32 : index
    %c0_11 = arith.constant 0 : index
    %11 = vector.load %arg2[%c0_10, %c32, %c0_11] : memref<1x288x12xbf16, #tpu.memory_space<vmem>>, vector<1x256x12xbf16>
    %12 = vector.shape_cast %11 : vector<1x256x12xbf16> to vector<256x12xbf16>
    %c2 = arith.constant 2 : index
    %c0_12 = arith.constant 0 : index
    %c0_13 = arith.constant 0 : index
    %13 = vector.load %arg3[%c2, %c0_12, %c0_13] : memref<3x12x128xbf16, #tpu.memory_space<vmem>>, vector<1x12x128xbf16>
    %14 = vector.shape_cast %13 : vector<1x12x128xbf16> to vector<12x128xbf16>
    %cst_14 = arith.constant dense<0.000000e+00> : vector<256x128xf32>
    %15 = tpu.matmul %12, %14, %cst_14 {dimension_numbers = #tpu.dot_dimension_numbers<[1], [0], [0], [1], [0, 0, 1, 1], [], []>} : vector<256x12xbf16>, vector<12x128xbf16>, vector<256x128xf32> -> vector<256x128xf32>
    %16 = arith.addf %10, %15 : vector<256x128xf32>
    %c0_15 = arith.constant 0 : index
    %c0_16 = arith.constant 0 : index
    %17 = vector.load %arg4[%c0_15, %c0_16] : memref<1x128xf32, #tpu.memory_space<vmem>>, vector<1x128xf32>
    %18 = vector.broadcast %17 : vector<1x128xf32> to vector<256x128xf32>
    %19 = arith.mulf %16, %18 : vector<256x128xf32>
    %c0_17 = arith.constant 0 : index
    %c0_18 = arith.constant 0 : index
    %20 = vector.load %arg5[%c0_17, %c0_18] : memref<1x128xf32, #tpu.memory_space<vmem>>, vector<1x128xf32>
    %21 = vector.broadcast %20 : vector<1x128xf32> to vector<256x128xf32>
    %22 = arith.addf %19, %21 : vector<256x128xf32>
    %cst_19 = arith.constant 0.000000e+00 : f32
    %23 = vector.broadcast %cst_19 : f32 to vector<256x128xf32>
    %24 = arith.cmpf oge, %22, %23 : vector<256x128xf32>
    %cst_20 = arith.constant 2.000000e-01 : f32
    %25 = vector.broadcast %cst_20 : f32 to vector<256x128xf32>
    %26 = arith.mulf %25, %22 : vector<256x128xf32>
    %27 = arith.select %24, %22, %26 : vector<256x128xi1>, vector<256x128xf32>
    %c0_21 = arith.constant 0 : index
    %c0_22 = arith.constant 0 : index
    %c0_23 = arith.constant 0 : index
    %28 = vector.load %arg6[%c0_21, %c0_22, %c0_23] : memref<1x256x128xf32, #tpu.memory_space<vmem>>, vector<1x256x128xf32>
    %29 = vector.shape_cast %28 : vector<1x256x128xf32> to vector<256x128xf32>
    %30 = vector.shape_cast %27 : vector<256x128xf32> to vector<1x256x128xf32>
    tpu.vector_store %arg6[%c0_21, %c0_22, %c0_23], %30 {strides = array<i32>} : memref<1x256x128xf32, #tpu.memory_space<vmem>>, vector<1x256x128xf32>,
    return
  }
  func.func @transform_0(%arg0: i32, %arg1: i32) -> (i32, i32, i32) {
    %c1_i32 = arith.constant 1 : i32
    %0 = arith.muli %arg0, %c1_i32 : i32
    %1 = arith.addi %0, %arg1 : i32
    %c0_i32 = arith.constant 0 : i32
    %c0_i32_0 = arith.constant 0 : i32
    %c0_i32_1 = arith.constant 0 : i32
    return %1, %c0_i32, %c0_i32_0 : i32, i32, i32
  }
  func.func @transform_1(%arg0: i32, %arg1: i32) -> (i32, i32, i32) {
    %c0_i32 = arith.constant 0 : i32
    %c0_i32_0 = arith.constant 0 : i32
    %c0_i32_1 = arith.constant 0 : i32
    %c0_i32_2 = arith.constant 0 : i32
    return %c0_i32, %c0_i32_0, %c0_i32_1 : i32, i32, i32
  }
  func.func @transform_2(%arg0: i32, %arg1: i32) -> (i32, i32) {
    %c0_i32 = arith.constant 0 : i32
    %c0_i32_0 = arith.constant 0 : i32
    %c0_i32_1 = arith.constant 0 : i32
    return %c0_i32, %c0_i32_0 : i32, i32
  }
  func.func @transform_3(%arg0: i32, %arg1: i32) -> (i32, i32) {
    %c0_i32 = arith.constant 0 : i32
    %c0_i32_0 = arith.constant 0 : i32
    %c0_i32_1 = arith.constant 0 : i32
    return %c0_i32, %c0_i32_0 : i32, i32
  }
  func.func @transform_4(%arg0: i32, %arg1: i32) -> (i32, i32, i32) {
    %c1_i32 = arith.constant 1 : i32
    %0 = arith.muli %arg0, %c1_i32 : i32
    %1 = arith.addi %0, %arg1 : i32
    %c0_i32 = arith.constant 0 : i32
    %c0_i32_0 = arith.constant 0 : i32
    %c0_i32_1 = arith.constant 0 : i32
    return %1, %c0_i32, %c0_i32_0 : i32, i32, i32
  }
}

</mosaic_0001>

<bundles_post_ra>
// kernel: _lambda_.2
= control target key start
LH: loop header
LB: loop body
LE: loop exit
PB: predicated region body
PF: predicated region fallthrough
CT: control target
= control target key end

     0   :  { %s1704_s12 = smov 0   ;;  %s1706_s13 = smov 0   ;;  %s1850_s0 = inlined_call_operand.vmem [shape: bf16[2,288,12], index: 0, kind: input, shape index: {}]   ;;  %s1851_s1 = inlined_call_operand.vmem [shape: bf16[3,12,128], index: 1, kind: input, shape index: {}]   ;;  %s1852_s2 = inlined_call_operand.vmem [shape: f32[2,1,128], index: 2, kind: output, shape index: {0}]   ;;  %s1853_s3 = inlined_call_operand.vmem [shape: f32[2,1,128], index: 3, kind: output, shape index: {1}]  }
   0x1   :  { %s1708_s14 = smov 0  }
   0x2 LB: > { %s26_s15 = sadd.s32 1, %s1678_s13  ;;  %p1284_p0 = scmp.ge.s32.totalorder %s1682_s14, 1  ;;  %s1682_s14 = sphi %s1708_s14, %s14_s14   ;;  %s1678_s13 = sphi %s1706_s13, %s1855_s13   ;;  %s1674_s12 = sphi %s1704_s12, %s1854_s12  }
   0x3   : > { %p28_p1 = scmp.ge.s32.totalorder %s26_s15, 2  ;;  %p160_p2 = scmp.lt.s32.totalorder %s1682_s14, 3 }
   0x5   : > { %s1857_s15 = smov (%p28_p1, %s26_s15), 0  ;;  %p161_p3 = pnand %p1284_p0, %p160_p2 }
   0x6   : > { %v1624_v0 = vld [vmem:[%s1851_s1 + $0x8] sm:$0x3f] (!%p161_p3)   ;;  %vm379_vm0 = vcmask (!%p161_p3), 1045504   ;;  %p189_p4 = scmp.lt.s32.totalorder (!%p161_p3), %s1674_s12, 1  ;;  %v1625_v1 = vld [vmem:[%s1851_s1] sm:$0x3f] (!%p161_p3)  }
   0x7   : > { %164 = sbr.rel (%p161_p3) target bundleno = 346 (0x15a), region = 28  ;;  %1595 = vmatprep.subr.msk.bf16.mxu1 (!%p161_p3), %vm379_vm0, %v1624_v0  ;;  %v381_v2 = vsel (!%p161_p3), %vm379_vm0, %v1624_v0, 0  ;;  %v1628_v3 = vld [vmem:[%s1851_s1 + $0x10] sm:$0x3f] (!%p161_p3)   ;;  %1596 = vmatprep.subr.msk.bf16.mxu0 (!%p161_p3), %vm379_vm0, %v1625_v1  ;;  %v558_v4 = vsel (!%p161_p3), %vm379_vm0, %v1625_v1, 0  ;;  %vm330_vm1 = vcmask (!%p161_p3), 97280  }
   0x8   : > { %1428 = vmatpush3.bf16.msra.mxu1 (!%p161_p3), %v381_v2  ;;  %1462 = vmatpush3.bf16.msra.mxu0 (!%p161_p3), %v558_v4  ;;  %v890_v8 = vsel (!%p161_p3), %vm379_vm0, %v1628_v3, 0 }
   0x9   : > { %1597 = vmatprep.subr.msk.bf16.mxu1 (!%p161_p3), %vm379_vm0, %v1625_v1  ;;  %1598 = vmatprep.subr.msk.bf16.mxu0 (!%p161_p3), %vm379_vm0, %v1628_v3 }
   0xe   : > { %s1859_s12 = smov (!%p189_p4, %s1674_s12), 1 }
   0xf   : > { %s1599_s22 = smul.u32 144, %s1859_s12  ;;  %s198_s28 = scalar_lea.vmem %s1852_s2, %s1859_s12 }
  0x10   : > { %s203_s4 = scalar_lea.vmem %s1853_s3, %s1859_s12 }
  0x11   : > { %s1743_s25 = scalar_lea.vmem %s1850_s0, %s1599_s22 }
  0x12   : > { %v1626_v5 = vld [vmem:[%s1743_s25 + $0x8] sm:$0xff]   ;;  %v1627_v6 = vld [vmem:[%s1743_s25] sm:$0xff]   ;;  %v1629_v7 = vld [vmem:[%s1743_s25 + $0x10] sm:$0xff]  }
  0x13   : > { %1429 = vmatprep.mubr.msk.bf16.mxu1 %vm330_vm1, %v1626_v5  ;;  %1463 = vmatprep.mubr.msk.bf16.mxu0 %vm330_vm1, %v1627_v6  ;;  %v1630_v9 = vld [vmem:[%s1743_s25 + $0x18] sm:$0xff]   ;;  %v1631_v10 = vld [vmem:[%s1743_s25 + $0x20] sm:$0xff]   ;;  %v1632_v11 = vld [vmem:[%s1743_s25 + $0x28] sm:$0xff]  }
  0x14   : > { %1430 = vmatmul.mubr.msk.bf16.vlgmr.msra.gmra.mrb[0].mxu1 %vm330_vm1, %v1629_v7  ;;  %1464 = vmatmul.mubr.msk.bf16.vlgmr.msra.gmra.mrb[0].mxu0 %vm330_vm1, %v1626_v5  ;;  %v1633_v12 = vld [vmem:[%s1743_s25 + $0x30] sm:$0xff]   ;;  %v1634_v13 = vld [vmem:[%s1743_s25 + $0x38] sm:$0xff]   ;;  %v1635_v14 = vld [vmem:[%s1743_s25 + $0x40] sm:$0xff]  }
  0x15   : > { %1530 = vmatpush3.bf16.msra.mxu1 %v558_v4  ;;  %1496 = vmatpush3.bf16.msra.mxu0 %v890_v8  ;;  %v1636_v15 = vld [vmem:[%s1743_s25 + $0x48] sm:$0xff]   ;;  %v1637_v16 = vld [vmem:[%s1743_s25 + $0x10] sm:$0xff]   ;;  %v1639_v18 = vld [vmem:[%s1743_s25 + $0x18] sm:$0xff]  }
  0x16   : > { %1433 = vmatprep.mubr.msk.bf16.mxu1 %vm330_vm1, %v1630_v9  ;;  %1467 = vmatprep.mubr.msk.bf16.mxu0 %vm330_vm1, %v1629_v7  ;;  %v1638_v17 = vld [vmem:[%s1743_s25 + $0x50] sm:$0xff]   ;;  %v1640_v19 = vld [vmem:[%s1743_s25 + $0x58] sm:$0xff]   ;;  %v1641_v20 = vld [vmem:[%s1743_s25 + $0x20] sm:$0xff]  }
  0x17   : > { %v1642_v21 = vld [vmem:[%s1743_s25 + $0x60] sm:$0xff]   ;;  %v1643_v22 = vld [vmem:[%s1743_s25 + $0x28] sm:$0xff]   ;;  %v1645_v24 = vld [vmem:[%s1743_s25 + $0x30] sm:$0xff]  }
  0x18   : > { %v1644_v23 = vld [vmem:[%s1743_s25 + $0x68] sm:$0xff]   ;;  %v1646_v25 = vld [vmem:[%s1743_s25 + $0x70] sm:$0xff]   ;;  %v1647_v26 = vld [vmem:[%s1743_s25 + $0x38] sm:$0xff]  }
  0x19   : > { %v1648_v27 = vld [vmem:[%s1743_s25 + $0x78] sm:$0xff]   ;;  %v1649_v28 = vld [vmem:[%s1743_s25 + $0x40] sm:$0xff]   ;;  %v1651_v30 = vld [vmem:[%s1743_s25 + $0x48] sm:$0xff]  }
  0x1a   : > { %v1650_v29 = vld [vmem:[%s1743_s25 + $0x80] sm:$0xff]   ;;  %v1652_v31 = vld [vmem:[%s1743_s25 + $0x50] sm:$0xff]   ;;  %v1653_v32 = vld [vmem:[%s1743_s25 + $0x58] sm:$0xff]  }
  0x1b   : > { %v1654_v33 = vld [vmem:[%s1743_s25 + $0x60] sm:$0xff]   ;;  %v1655_v34 = vld [vmem:[%s1743_s25 + $0x68] sm:$0xff]   ;;  %v1656_v35 = vld [vmem:[%s1743_s25 + $0x70] sm:$0xff]  }
  0x1c   : > { %1434 = vmatmul.mubr.msk.bf16.gmra.mrb[4].mxu1 %vm330_vm1, %v1631_v10  ;;  %1468 = vmatmul.mubr.msk.bf16.gmra.mrb[4].mxu0 %vm330_vm1, %v1630_v9  ;;  %v1657_v36 = vld [vmem:[%s1743_s25 + $0x78] sm:$0xff]   ;;  %v1658_v37 = vld [vmem:[%s1743_s25 + $0x80] sm:$0xff]   ;;  %v1659_v38 = vld [vmem:[%s1743_s25 + $0x88] sm:$0xff]  }
  0x1d   : > { %1437 = vmatprep.mubr.msk.bf16.mxu1 %vm330_vm1, %v1632_v11  ;;  %1471 = vmatprep.mubr.msk.bf16.mxu0 %vm330_vm1, %v1631_v10 }
  0x24   : > { %1438 = vmatmul.mubr.msk.bf16.gmra.mrb[8].mxu1 %vm330_vm1, %v1633_v12  ;;  %1472 = vmatmul.mubr.msk.bf16.gmra.mrb[8].mxu0 %vm330_vm1, %v1632_v11 }
  0x25   : > { %1441 = vmatprep.mubr.msk.bf16.mxu1 %vm330_vm1, %v1634_v13  ;;  %1475 = vmatprep.mubr.msk.bf16.mxu0 %vm330_vm1, %v1633_v12 }
  0x2c   : > { %1442 = vmatmul.mubr.msk.bf16.gmra.mrb[12].mxu1 %vm330_vm1, %v1635_v14  ;;  %1476 = vmatmul.mubr.msk.bf16.gmra.mrb[12].mxu0 %vm330_vm1, %v1634_v13 }
  0x2d   : > { %1445 = vmatprep.mubr.msk.bf16.mxu1 %vm330_vm1, %v1636_v15  ;;  %1497 = vmatprep.mubr.msk.bf16.mxu0 %vm330_vm1, %v1637_v16 }
  0x34   : > { %1446 = vmatmul.mubr.msk.bf16.gmra.mrb[16].mxu1 %vm330_vm1, %v1638_v17  ;;  %1498 = vmatmul.mubr.msk.bf16.vlgmr.msra.gmra.mrb[0].mxu0 %vm330_vm1, %v1639_v18 }
  0x35   : > { %1449 = vmatprep.mubr.msk.bf16.mxu1 %vm330_vm1, %v1640_v19  ;;  %1501 = vmatprep.mubr.msk.bf16.mxu0 %vm330_vm1, %v1641_v20 }
  0x3c   : > { %1450 = vmatmul.mubr.msk.bf16.gmra.mrb[20].mxu1 %vm330_vm1, %v1642_v21  ;;  %1502 = vmatmul.mubr.msk.bf16.gmra.mrb[4].mxu0 %vm330_vm1, %v1643_v22 }
  0x3d   : > { %1453 = vmatprep.mubr.msk.bf16.mxu1 %vm330_vm1, %v1644_v23  ;;  %1505 = vmatprep.mubr.msk.bf16.mxu0 %vm330_vm1, %v1645_v24 }
  0x44   : > { %1454 = vmatmul.mubr.msk.bf16.gmra.mrb[24].mxu1 %vm330_vm1, %v1646_v25  ;;  %1506 = vmatmul.mubr.msk.bf16.gmra.mrb[8].mxu0 %vm330_vm1, %v1647_v26 }
  0x45   : > { %1457 = vmatprep.mubr.msk.bf16.mxu1 %vm330_vm1, %v1648_v27  ;;  %1509 = vmatprep.mubr.msk.bf16.mxu0 %vm330_vm1, %v1649_v28 }
  0x4c   : > { %1458 = vmatmul.mubr.msk.bf16.gmra.mrb[28].mxu1 %vm330_vm1, %v1650_v29  ;;  %1510 = vmatmul.mubr.msk.bf16.gmra.mrb[12].mxu0 %vm330_vm1, %v1651_v30 }
  0x4d   : > { %1479 = vmatprep.mubr.msk.bf16.mxu1 %vm330_vm1, %v1635_v14  ;;  %1513 = vmatprep.mubr.msk.bf16.mxu0 %vm330_vm1, %v1652_v31 }
  0x54   : > { %1480 = vmatmul.mubr.msk.bf16.vlgmr.msra.gmra.mrb[16].mxu1 %vm330_vm1, %v1636_v15  ;;  %1514 = vmatmul.mubr.msk.bf16.gmra.mrb[16].mxu0 %vm330_vm1, %v1653_v32 }
  0x55   : > { %1483 = vmatprep.mubr.msk.bf16.mxu1 %vm330_vm1, %v1638_v17  ;;  %1517 = vmatprep.mubr.msk.bf16.mxu0 %vm330_vm1, %v1654_v33 }
  0x5c   : > { %1484 = vmatmul.mubr.msk.bf16.gmra.mrb[20].mxu1 %vm330_vm1, %v1640_v19  ;;  %1518 = vmatmul.mubr.msk.bf16.gmra.mrb[20].mxu0 %vm330_vm1, %v1655_v34 }
  0x5d   : > { %1487 = vmatprep.mubr.msk.bf16.mxu1 %vm330_vm1, %v1642_v21  ;;  %1521 = vmatprep.mubr.msk.bf16.mxu0 %vm330_vm1, %v1656_v35 }
  0x64   : > { %1488 = vmatmul.mubr.msk.bf16.gmra.mrb[24].mxu1 %vm330_vm1, %v1644_v23  ;;  %1522 = vmatmul.mubr.msk.bf16.gmra.mrb[24].mxu0 %vm330_vm1, %v1657_v36 }
  0x65   : > { %1491 = vmatprep.mubr.msk.bf16.mxu1 %vm330_vm1, %v1646_v25  ;;  %1525 = vmatprep.mubr.msk.bf16.mxu0 %vm330_vm1, %v1658_v37 }
  0x6c   : > { %1492 = vmatmul.mubr.msk.bf16.gmra.mrb[28].mxu1 %vm330_vm1, %v1648_v27  ;;  %1526 = vmatmul.mubr.msk.bf16.gmra.mrb[28].mxu0 %vm330_vm1, %v1659_v38 }
  0xe7   : > { %v1431_v39 = vpop.f32.mrb[0].mxu1 }
  0xe8   : > { %v417_v40 = vpop.f32.mrb[1].mxu1 }
  0xe9   : > { %v1432_v41 = vpop.f32.mrb[2].mxu1 }
  0xea   : > { %v420_v42 = vpop.f32.mrb[3].mxu1 }
  0xef   : > { %v1435_v43 = vpop.f32.mrb[4].mxu1 }
  0xf0   : > { %v433_v44 = vpop.f32.mrb[5].mxu1 }
  0xf1   : > { %v1436_v45 = vpop.f32.mrb[6].mxu1 }
  0xf2   : > { %v436_v46 = vpop.f32.mrb[7].mxu1 }
  0xf7   : > { %v1439_v47 = vpop.f32.mrb[8].mxu1 }
  0xf8   : > { %v449_v48 = vpop.f32.mrb[9].mxu1 }
  0xf9   : > { %v1440_v49 = vpop.f32.mrb[10].mxu1 }
  0xfa   : > { %v452_v50 = vpop.f32.mrb[11].mxu1 }
  0xff   : > { %v1443_v51 = vpop.f32.mrb[12].mxu1 }
 0x100   : > { %v465_v52 = vpop.f32.mrb[13].mxu1 }
 0x101   : > { %v1827_v53 = vpop.f32.mrb[14].mxu1 }
 0x102   : > { %v1829_v54 = vpop.f32.mrb[15].mxu1 }
 0x107   : > { %v1499_v55 = vpop.f32.mrb[0].mxu0 }
 0x108   : > { %v1531_v56 = vadd.f32 %v1499_v55, %v1431_v39  ;;  %v926_v57 = vpop.f32.mrb[1].mxu0 }
 0x109   : > { %v1532_v58 = vadd.f32 %v926_v57, %v417_v40  ;;  %v1500_v59 = vpop.f32.mrb[2].mxu0 }
 0x10a   : > { %v1533_v60 = vadd.f32 %v1500_v59, %v1432_v41  ;;  %v929_v61 = vpop.f32.mrb[3].mxu0  ;;  %v1125_v2 = vmul.f32 %v1531_v56, %v1531_v56 }
 0x10b   : > { %v1534_v62 = vadd.f32 %v929_v61, %v420_v42  ;;  %v1123_v63 = vmul.f32 %v1532_v58, %v1532_v58 }
 0x10c   : > { %v1126_v8 = vmul.f32 %v1533_v60, %v1533_v60 }
 0x10d   : > { %v1085_v0 = vadd.f32 %v1534_v62, %v1532_v58  ;;  %v1124_v1 = vmul.f32 %v1534_v62, %v1534_v62 }
 0x10f   : > { %v1086_v3 = vadd.f32 %v1531_v56, %v1085_v0  ;;  %v1155_v4 = vadd.f32 %v1124_v1, %v1123_v63  ;;  %v1503_v5 = vpop.f32.mrb[4].mxu0 }
 0x110   : > { %v1535_v6 = vadd.f32 %v1503_v5, %v1435_v43  ;;  %v942_v7 = vpop.f32.mrb[5].mxu0 }
 0x111   : > { %v1156_v9 = vadd.f32 %v1155_v4, %v1125_v2  ;;  %v1536_v10 = vadd.f32 %v942_v7, %v433_v44  ;;  %v1087_v11 = vadd.f32 %v1533_v60, %v1086_v3  ;;  %v1504_v12 = vpop.f32.mrb[6].mxu0 }
 0x112   : > { %v1537_v13 = vadd.f32 %v1504_v12, %v1436_v45  ;;  %v945_v14 = vpop.f32.mrb[7].mxu0  ;;  %v1129_v22 = vmul.f32 %v1535_v6, %v1535_v6 }
 0x113   : > { %v1088_v15 = vadd.f32 %v1536_v10, %v1087_v11  ;;  %v1127_v16 = vmul.f32 %v1536_v10, %v1536_v10  ;;  %v1157_v17 = vadd.f32 %v1156_v9, %v1126_v8  ;;  %v1538_v18 = vadd.f32 %v945_v14, %v436_v46 }
 0x114   : > { %v1130_v28 = vmul.f32 %v1537_v13, %v1537_v13 }
 0x115   : > { %v1158_v19 = vadd.f32 %v1157_v17, %v1127_v16  ;;  %v1089_v20 = vadd.f32 %v1538_v18, %v1088_v15  ;;  %v1128_v21 = vmul.f32 %v1538_v18, %v1538_v18 }
 0x117   : > { %v1090_v23 = vadd.f32 %v1535_v6, %v1089_v20  ;;  %v1159_v24 = vadd.f32 %v1158_v19, %v1128_v21  ;;  %v1507_v25 = vpop.f32.mrb[8].mxu0 }
 0x118   : > { %v1539_v26 = vadd.f32 %v1507_v25, %v1439_v47  ;;  %v958_v27 = vpop.f32.mrb[9].mxu0 }
 0x119   : > { %v1160_v29 = vadd.f32 %v1159_v24, %v1129_v22  ;;  %v1540_v30 = vadd.f32 %v958_v27, %v449_v48  ;;  %v1091_v31 = vadd.f32 %v1537_v13, %v1090_v23  ;;  %v1508_v32 = vpop.f32.mrb[10].mxu0 }
 0x11a   : > { %v1541_v33 = vadd.f32 %v1508_v32, %v1440_v49  ;;  %v961_v34 = vpop.f32.mrb[11].mxu0  ;;  %v1133_v42 = vmul.f32 %v1539_v26, %v1539_v26 }
 0x11b   : > { %v1092_v35 = vadd.f32 %v1540_v30, %v1091_v31  ;;  %v1131_v36 = vmul.f32 %v1540_v30, %v1540_v30  ;;  %v1161_v37 = vadd.f32 %v1160_v29, %v1130_v28  ;;  %v1542_v38 = vadd.f32 %v961_v34, %v452_v50 }
 0x11c   : > { %v1134_v55 = vmul.f32 %v1541_v33, %v1541_v33 }
 0x11d   : > { %v1162_v39 = vadd.f32 %v1161_v37, %v1131_v36  ;;  %v1093_v40 = vadd.f32 %v1542_v38, %v1092_v35  ;;  %v1132_v41 = vmul.f32 %v1542_v38, %v1542_v38 }
 0x11f   : > { %v1094_v43 = vadd.f32 %v1539_v26, %v1093_v40  ;;  %v1163_v44 = vadd.f32 %v1162_v39, %v1132_v41  ;;  %v1511_v45 = vpop.f32.mrb[12].mxu0 }
 0x120   : > { %v1543_v46 = vadd.f32 %v1511_v45, %v1443_v51  ;;  %v974_v47 = vpop.f32.mrb[13].mxu0 }
 0x121   : > { %v1164_v56 = vadd.f32 %v1163_v44, %v1133_v42  ;;  %v1544_v48 = vadd.f32 %v974_v47, %v465_v52  ;;  %v1095_v57 = vadd.f32 %v1541_v33, %v1094_v43  ;;  %v1512_v58 = vpop.f32.mrb[14].mxu0 }
 0x122   : > { %v1545_v49 = vadd.f32 %v1512_v58, %v1827_v53  ;;  %v977_v59 = vpop.f32.mrb[15].mxu0  ;;  %v1137_v2 = vmul.f32 %v1543_v46, %v1543_v46 }
 0x123   : > { %v1096_v60 = vadd.f32 %v1544_v48, %v1095_v57  ;;  %v1135_v61 = vmul.f32 %v1544_v48, %v1544_v48  ;;  %v1165_v50 = vadd.f32 %v1164_v56, %v1134_v55  ;;  %v1546_v62 = vadd.f32 %v977_v59, %v1829_v54 }
 0x124   : > { %v1138_v8 = vmul.f32 %v1545_v49, %v1545_v49 }
 0x125   : > { %v1166_v63 = vadd.f32 %v1165_v50, %v1135_v61  ;;  %v1097_v0 = vadd.f32 %v1546_v62, %v1096_v60  ;;  %v1136_v1 = vmul.f32 %v1546_v62, %v1546_v62 }
 0x127   : > { %v1098_v3 = vadd.f32 %v1543_v46, %v1097_v0  ;;  %v1167_v51 = vadd.f32 %v1166_v63, %v1136_v1  ;;  %v1481_v4 = vpop.f32.mrb[16].mxu1  ;;  %v1515_v5 = vpop.f32.mrb[16].mxu0 }
 0x128   : > { %v1547_v6 = vadd.f32 %v1515_v5, %v1481_v4  ;;  %v658_v52 = vpop.f32.mrb[17].mxu1  ;;  %v990_v7 = vpop.f32.mrb[17].mxu0 }
 0x129   : > { %v1168_v9 = vadd.f32 %v1167_v51, %v1137_v2  ;;  %v1548_v53 = vadd.f32 %v990_v7, %v658_v52  ;;  %v1099_v10 = vadd.f32 %v1545_v49, %v1098_v3  ;;  %v1482_v11 = vpop.f32.mrb[18].mxu1  ;;  %v1516_v12 = vpop.f32.mrb[18].mxu0 }
 0x12a   : > { %v1549_v13 = vadd.f32 %v1516_v12, %v1482_v11  ;;  %v661_v14 = vpop.f32.mrb[19].mxu1  ;;  %v993_v54 = vpop.f32.mrb[19].mxu0  ;;  %v1141_v22 = vmul.f32 %v1547_v6, %v1547_v6 }
 0x12b   : > { %v1100_v15 = vadd.f32 %v1548_v53, %v1099_v10  ;;  %v1139_v16 = vmul.f32 %v1548_v53, %v1548_v53  ;;  %v1169_v17 = vadd.f32 %v1168_v9, %v1138_v8  ;;  %v1550_v18 = vadd.f32 %v993_v54, %v661_v14 }
 0x12c   : > { %v1142_v30 = vmul.f32 %v1549_v13, %v1549_v13 }
 0x12d   : > { %v1170_v19 = vadd.f32 %v1169_v17, %v1139_v16  ;;  %v1101_v20 = vadd.f32 %v1550_v18, %v1100_v15  ;;  %v1140_v21 = vmul.f32 %v1550_v18, %v1550_v18 }
 0x12f   : > { %v1102_v23 = vadd.f32 %v1547_v6, %v1101_v20  ;;  %v1171_v24 = vadd.f32 %v1170_v19, %v1140_v21  ;;  %v1485_v25 = vpop.f32.mrb[20].mxu1  ;;  %v1519_v26 = vpop.f32.mrb[20].mxu0 }
 0x130   : > { %v1551_v27 = vadd.f32 %v1519_v26, %v1485_v25  ;;  %v674_v28 = vpop.f32.mrb[21].mxu1  ;;  %v1006_v29 = vpop.f32.mrb[21].mxu0 }
 0x131   : > { %v1172_v31 = vadd.f32 %v1171_v24, %v1141_v22  ;;  %v1552_v32 = vadd.f32 %v1006_v29, %v674_v28  ;;  %v1103_v33 = vadd.f32 %v1549_v13, %v1102_v23  ;;  %v1486_v34 = vpop.f32.mrb[22].mxu1  ;;  %v1520_v35 = vpop.f32.mrb[22].mxu0 }
 0x132   : > { %v1553_v36 = vadd.f32 %v1520_v35, %v1486_v34  ;;  %v677_v37 = vpop.f32.mrb[23].mxu1  ;;  %v1009_v38 = vpop.f32.mrb[23].mxu0  ;;  %v1145_v46 = vmul.f32 %v1551_v27, %v1551_v27 }
 0x133   : > { %v1104_v39 = vadd.f32 %v1552_v32, %v1103_v33  ;;  %v1143_v40 = vmul.f32 %v1552_v32, %v1552_v32  ;;  %v1173_v41 = vadd.f32 %v1172_v31, %v1142_v30  ;;  %v1554_v42 = vadd.f32 %v1009_v38, %v677_v37 }
 0x134   : > { %v1146_v59 = vmul.f32 %v1553_v36, %v1553_v36 }
 0x135   : > { %v1174_v43 = vadd.f32 %v1173_v41, %v1143_v40  ;;  %v1105_v44 = vadd.f32 %v1554_v42, %v1104_v39  ;;  %v1144_v45 = vmul.f32 %v1554_v42, %v1554_v42 }
 0x137   : > { %v1106_v47 = vadd.f32 %v1551_v27, %v1105_v44  ;;  %v1175_v55 = vadd.f32 %v1174_v43, %v1144_v45  ;;  %v1489_v56 = vpop.f32.mrb[24].mxu1  ;;  %v1523_v48 = vpop.f32.mrb[24].mxu0 }
 0x138   : > { %v1555_v57 = vadd.f32 %v1523_v48, %v1489_v56  ;;  %v690_v58 = vpop.f32.mrb[25].mxu1  ;;  %v1022_v49 = vpop.f32.mrb[25].mxu0 }
 0x139   : > { %v1176_v60 = vadd.f32 %v1175_v55, %v1145_v46  ;;  %v1556_v61 = vadd.f32 %v1022_v49, %v690_v58  ;;  %v1107_v50 = vadd.f32 %v1553_v36, %v1106_v47  ;;  %v1490_v62 = vpop.f32.mrb[26].mxu1  ;;  %v1524_v63 = vpop.f32.mrb[26].mxu0 }
 0x13a   : > { %v1557_v0 = vadd.f32 %v1524_v63, %v1490_v62  ;;  %v693_v1 = vpop.f32.mrb[27].mxu1  ;;  %v1025_v2 = vpop.f32.mrb[27].mxu0  ;;  %v1149_v8 = vmul.f32 %v1555_v57, %v1555_v57 }
 0x13b   : > { %v1108_v3 = vadd.f32 %v1556_v61, %v1107_v50  ;;  %v1147_v51 = vmul.f32 %v1556_v61, %v1556_v61  ;;  %v1177_v4 = vadd.f32 %v1176_v60, %v1146_v59  ;;  %v1558_v5 = vadd.f32 %v1025_v2, %v693_v1 }
 0x13c   : > { %v1150_v54 = vmul.f32 %v1557_v0, %v1557_v0 }
 0x13d   : > { %v1178_v6 = vadd.f32 %v1177_v4, %v1147_v51  ;;  %v1109_v52 = vadd.f32 %v1558_v5, %v1108_v3  ;;  %v1148_v7 = vmul.f32 %v1558_v5, %v1558_v5 }
 0x13f   : > { %v1110_v9 = vadd.f32 %v1555_v57, %v1109_v52  ;;  %v1179_v53 = vadd.f32 %v1178_v6, %v1148_v7  ;;  %v1493_v10 = vpop.f32.mrb[28].mxu1  ;;  %v1527_v11 = vpop.f32.mrb[28].mxu0 }
 0x140   : > { %v1559_v12 = vadd.f32 %v1527_v11, %v1493_v10  ;;  %v706_v13 = vpop.f32.mrb[29].mxu1  ;;  %v1038_v14 = vpop.f32.mrb[29].mxu0 }
 0x141   : > { %v1180_v15 = vadd.f32 %v1179_v53, %v1149_v8  ;;  %v1560_v16 = vadd.f32 %v1038_v14, %v706_v13  ;;  %v1111_v17 = vadd.f32 %v1557_v0, %v1110_v9  ;;  %v1494_v18 = vpop.f32.mrb[30].mxu1  ;;  %v1528_v19 = vpop.f32.mrb[30].mxu0 }
 0x142   : > { %v1561_v20 = vadd.f32 %v1528_v19, %v1494_v18  ;;  %v709_v21 = vpop.f32.mrb[31].mxu1  ;;  %v1041_v22 = vpop.f32.mrb[31].mxu0  ;;  %v1153_v30 = vmul.f32 %v1559_v12, %v1559_v12 }
 0x143   : > { %v1112_v23 = vadd.f32 %v1560_v16, %v1111_v17  ;;  %v1151_v24 = vmul.f32 %v1560_v16, %v1560_v16  ;;  %v1181_v25 = vadd.f32 %v1180_v15, %v1150_v54  ;;  %v1562_v26 = vadd.f32 %v1041_v22, %v709_v21 }
 0x144   : > { %v1154_v33 = vmul.f32 %v1561_v20, %v1561_v20 }
 0x145   : > { %v1182_v27 = vadd.f32 %v1181_v25, %v1151_v24  ;;  %v1113_v28 = vadd.f32 %v1562_v26, %v1112_v23  ;;  %v1152_v29 = vmul.f32 %v1562_v26, %v1562_v26 }
 0x147   : > { %v1114_v31 = vadd.f32 %v1559_v12, %v1113_v28  ;;  %v1183_v32 = vadd.f32 %v1182_v27, %v1152_v29 }
 0x149   : > { %v1115_v34 = vadd.f32 %v1561_v20, %v1114_v31  ;;  %v1184_v35 = vadd.f32 %v1183_v32, %v1153_v30 }
 0x14b   : > { %v1116_v36 = vrot.slane %v1115_v34, 4  ;;  %v1185_v37 = vadd.f32 %v1184_v35, %v1154_v33 }
 0x14d   : > { %v1117_v38 = vadd.f32 %v1116_v36, %v1115_v34  ;;  %v1186_v39 = vrot.slane %v1185_v37, 4 }
 0x14f   : > { %v1118_v40 = vrot.slane %v1117_v38, 2  ;;  %v1187_v41 = vadd.f32 %v1186_v39, %v1185_v37 }
 0x151   : > { %v1119_v42 = vadd.f32 %v1118_v40, %v1117_v38  ;;  %v1188_v43 = vrot.slane %v1187_v41, 2 }
 0x153   : > { %v1120_v44 = vrot.slane %v1119_v42, 1  ;;  %v1189_v45 = vadd.f32 %v1188_v43, %v1187_v41 }
 0x155   : > { %v1121_v46 = vadd.f32 %v1120_v44, %v1119_v42  ;;  %v1190_v47 = vrot.slane %v1189_v45, 1 }
 0x157   : > { %1122 = vst [vmem:[%s198_s28] sm:$0x1] %v1121_v46  ;;  %v1191_v55 = vadd.f32 %v1190_v47, %v1189_v45 }
 0x159   : > { %1192 = vst [vmem:[%s203_s4] sm:$0x1] %v1191_v55 }
 0x15a PF: > { %s14_s14 = sadd.s32 1, %s1682_s14   ;;  %s1854_s12 = smov %s1678_s13 }
 0x15b   : > { %p11_p5 = scmp.ge.s32.totalorder %s14_s14, 4   ;;  %s1855_s13 = smov %s1857_s15 }
 0x15d   :  { %13 = sbr.rel (!%p11_p5) target bundleno = 2 (0x2), region = 72 }

// kernel: _lambda_.3
= control target key start
LH: loop header
LB: loop body
LE: loop exit
PB: predicated region body
PF: predicated region fallthrough
CT: control target
= control target key end

     0   :  { %s1809_s15 = smov 0   ;;  %s1811_s16 = smov 0   ;;  %s2077_s0 = inlined_call_operand.vmem [shape: bf16[2,288,12], index: 0, kind: input, shape index: {}]   ;;  %s2078_s1 = inlined_call_operand.vmem [shape: bf16[3,12,128], index: 1, kind: input, shape index: {}]   ;;  %s2079_s2 = inlined_call_operand.vmem [shape: f32[1,128], index: 2, kind: input, shape index: {}]   ;;  %s2080_s3 = inlined_call_operand.vmem [shape: f32[1,128], index: 3, kind: input, shape index: {}]   ;;  %s2081_s4 = inlined_call_operand.vmem [shape: f32[2,256,128], index: 4, kind: output, shape index: {}]  }
   0x1   :  { %s1813_s17 = smov 0  }
   0x2 LB: > { %s26_s18 = sadd.s32 1, %s1778_s16  ;;  %p1379_p0 = scmp.ge.s32.totalorder %s1782_s17, 1  ;;  %s1782_s17 = sphi %s1813_s17, %s14_s17   ;;  %s1778_s16 = sphi %s1811_s16, %s2083_s16   ;;  %s1774_s15 = sphi %s1809_s15, %s2082_s15  }
   0x3   : > { %p28_p1 = scmp.ge.s32.totalorder %s26_s18, 2  ;;  %p180_p2 = scmp.lt.s32.totalorder %s1782_s17, 3 }
   0x5   : > { %s2085_s18 = smov (%p28_p1, %s26_s18), 0  ;;  %p181_p3 = pnand %p1379_p0, %p180_p2 }
   0x6   : > { %v1724_v0 = vld [vmem:[%s2078_s1 + $0x8] sm:$0x3f] (!%p181_p3)   ;;  %vm396_vm0 = vcmask (!%p181_p3), 1045504   ;;  %p209_p4 = scmp.lt.s32.totalorder (!%p181_p3), %s1774_s15, 1  ;;  %v1725_v1 = vld [vmem:[%s2078_s1] sm:$0x3f] (!%p181_p3)  }
   0x7   : > { %184 = sbr.rel (%p181_p3) target bundleno = 333 (0x14d), region = 36  ;;  %1695 = vmatprep.subr.msk.bf16.mxu1 (!%p181_p3), %vm396_vm0, %v1724_v0  ;;  %v398_v2 = vsel (!%p181_p3), %vm396_vm0, %v1724_v0, 0  ;;  %v1728_v3 = vld [vmem:[%s2078_s1 + $0x10] sm:$0x3f] (!%p181_p3)   ;;  %1696 = vmatprep.subr.msk.bf16.mxu0 (!%p181_p3), %vm396_vm0, %v1725_v1  ;;  %v575_v4 = vsel (!%p181_p3), %vm396_vm0, %v1725_v1, 0  ;;  %vm347_vm1 = vcmask (!%p181_p3), 97280  }
   0x8   : > { %1528 = vmatpush3.bf16.msra.mxu1 (!%p181_p3), %v398_v2  ;;  %1562 = vmatpush3.bf16.msra.mxu0 (!%p181_p3), %v575_v4  ;;  %v907_v8 = vsel (!%p181_p3), %vm396_vm0, %v1728_v3, 0  ;;  %v1951_v56 = vld [vmem:[%s2079_s2] ss:$0 sm:$0xff] (!%p181_p3) }
   0x9   : > { %1697 = vmatprep.subr.msk.bf16.mxu1 (!%p181_p3), %vm396_vm0, %v1725_v1  ;;  %1698 = vmatprep.subr.msk.bf16.mxu0 (!%p181_p3), %vm396_vm0, %v1728_v3  ;;  %v1956_v59 = vld [vmem:[%s2080_s3] ss:$0 sm:$0xff] (!%p181_p3) }
   0xe   : > { %s2087_s15 = smov (!%p209_p4, %s1774_s15), 1 }
   0xf   : > { %s1699_s25 = smul.u32 144, %s2087_s15  ;;  %s1475_s7 = sshll.u32 %s2087_s15, 8 }
  0x10   : > { %s1968_s10 = scalar_lea.vmem %s2081_s4, %s1475_s7 }
  0x11   : > { %s1848_s28 = scalar_lea.vmem %s2077_s0, %s1699_s25 }
  0x12   : > { %v1726_v5 = vld [vmem:[%s1848_s28 + $0x8] sm:$0xff]   ;;  %v1727_v6 = vld [vmem:[%s1848_s28] sm:$0xff]   ;;  %v1729_v7 = vld [vmem:[%s1848_s28 + $0x10] sm:$0xff]  }
  0x13   : > { %1529 = vmatprep.mubr.msk.bf16.mxu1 %vm347_vm1, %v1726_v5  ;;  %1563 = vmatprep.mubr.msk.bf16.mxu0 %vm347_vm1, %v1727_v6  ;;  %v1730_v9 = vld [vmem:[%s1848_s28 + $0x18] sm:$0xff]   ;;  %v1731_v10 = vld [vmem:[%s1848_s28 + $0x20] sm:$0xff]   ;;  %v1732_v11 = vld [vmem:[%s1848_s28 + $0x28] sm:$0xff]  }
  0x14   : > { %1530 = vmatmul.mubr.msk.bf16.vlgmr.msra.gmra.mrb[0].mxu1 %vm347_vm1, %v1729_v7  ;;  %1564 = vmatmul.mubr.msk.bf16.vlgmr.msra.gmra.mrb[0].mxu0 %vm347_vm1, %v1726_v5  ;;  %v1733_v12 = vld [vmem:[%s1848_s28 + $0x30] sm:$0xff]   ;;  %v1734_v13 = vld [vmem:[%s1848_s28 + $0x38] sm:$0xff]   ;;  %v1735_v14 = vld [vmem:[%s1848_s28 + $0x40] sm:$0xff]  }
  0x15   : > { %1630 = vmatpush3.bf16.msra.mxu1 %v575_v4  ;;  %1596 = vmatpush3.bf16.msra.mxu0 %v907_v8  ;;  %v1736_v15 = vld [vmem:[%s1848_s28 + $0x48] sm:$0xff]   ;;  %v1737_v16 = vld [vmem:[%s1848_s28 + $0x10] sm:$0xff]   ;;  %v1739_v18 = vld [vmem:[%s1848_s28 + $0x18] sm:$0xff]  }
  0x16   : > { %1533 = vmatprep.mubr.msk.bf16.mxu1 %vm347_vm1, %v1730_v9  ;;  %1567 = vmatprep.mubr.msk.bf16.mxu0 %vm347_vm1, %v1729_v7  ;;  %v1738_v17 = vld [vmem:[%s1848_s28 + $0x50] sm:$0xff]   ;;  %v1740_v19 = vld [vmem:[%s1848_s28 + $0x58] sm:$0xff]   ;;  %v1741_v20 = vld [vmem:[%s1848_s28 + $0x20] sm:$0xff]  }
  0x17   : > { %v1742_v21 = vld [vmem:[%s1848_s28 + $0x60] sm:$0xff]   ;;  %v1743_v22 = vld [vmem:[%s1848_s28 + $0x28] sm:$0xff]   ;;  %v1745_v24 = vld [vmem:[%s1848_s28 + $0x30] sm:$0xff]  }
  0x18   : > { %v1744_v23 = vld [vmem:[%s1848_s28 + $0x68] sm:$0xff]   ;;  %v1746_v25 = vld [vmem:[%s1848_s28 + $0x70] sm:$0xff]   ;;  %v1747_v26 = vld [vmem:[%s1848_s28 + $0x38] sm:$0xff]  }
  0x19   : > { %v1748_v27 = vld [vmem:[%s1848_s28 + $0x78] sm:$0xff]   ;;  %v1749_v28 = vld [vmem:[%s1848_s28 + $0x40] sm:$0xff]   ;;  %v1751_v30 = vld [vmem:[%s1848_s28 + $0x48] sm:$0xff]  }
  0x1a   : > { %v1750_v29 = vld [vmem:[%s1848_s28 + $0x80] sm:$0xff]   ;;  %v1752_v31 = vld [vmem:[%s1848_s28 + $0x50] sm:$0xff]   ;;  %v1753_v32 = vld [vmem:[%s1848_s28 + $0x58] sm:$0xff]  }
  0x1b   : > { %v1754_v33 = vld [vmem:[%s1848_s28 + $0x60] sm:$0xff]   ;;  %v1755_v34 = vld [vmem:[%s1848_s28 + $0x68] sm:$0xff]   ;;  %v1756_v35 = vld [vmem:[%s1848_s28 + $0x70] sm:$0xff]  }
  0x1c   : > { %1534 = vmatmul.mubr.msk.bf16.gmra.mrb[4].mxu1 %vm347_vm1, %v1731_v10  ;;  %1568 = vmatmul.mubr.msk.bf16.gmra.mrb[4].mxu0 %vm347_vm1, %v1730_v9  ;;  %v1757_v36 = vld [vmem:[%s1848_s28 + $0x78] sm:$0xff]   ;;  %v1758_v37 = vld [vmem:[%s1848_s28 + $0x80] sm:$0xff]   ;;  %v1759_v38 = vld [vmem:[%s1848_s28 + $0x88] sm:$0xff]  }
  0x1d   : > { %1537 = vmatprep.mubr.msk.bf16.mxu1 %vm347_vm1, %v1732_v11  ;;  %1571 = vmatprep.mubr.msk.bf16.mxu0 %vm347_vm1, %v1731_v10 }
  0x24   : > { %1538 = vmatmul.mubr.msk.bf16.gmra.mrb[8].mxu1 %vm347_vm1, %v1733_v12  ;;  %1572 = vmatmul.mubr.msk.bf16.gmra.mrb[8].mxu0 %vm347_vm1, %v1732_v11 }
  0x25   : > { %1541 = vmatprep.mubr.msk.bf16.mxu1 %vm347_vm1, %v1734_v13  ;;  %1575 = vmatprep.mubr.msk.bf16.mxu0 %vm347_vm1, %v1733_v12 }
  0x2c   : > { %1542 = vmatmul.mubr.msk.bf16.gmra.mrb[12].mxu1 %vm347_vm1, %v1735_v14  ;;  %1576 = vmatmul.mubr.msk.bf16.gmra.mrb[12].mxu0 %vm347_vm1, %v1734_v13 }
  0x2d   : > { %1545 = vmatprep.mubr.msk.bf16.mxu1 %vm347_vm1, %v1736_v15  ;;  %1597 = vmatprep.mubr.msk.bf16.mxu0 %vm347_vm1, %v1737_v16 }
  0x34   : > { %1546 = vmatmul.mubr.msk.bf16.gmra.mrb[16].mxu1 %vm347_vm1, %v1738_v17  ;;  %1598 = vmatmul.mubr.msk.bf16.vlgmr.msra.gmra.mrb[0].mxu0 %vm347_vm1, %v1739_v18 }
  0x35   : > { %1549 = vmatprep.mubr.msk.bf16.mxu1 %vm347_vm1, %v1740_v19  ;;  %1601 = vmatprep.mubr.msk.bf16.mxu0 %vm347_vm1, %v1741_v20 }
  0x3c   : > { %1550 = vmatmul.mubr.msk.bf16.gmra.mrb[20].mxu1 %vm347_vm1, %v1742_v21  ;;  %1602 = vmatmul.mubr.msk.bf16.gmra.mrb[4].mxu0 %vm347_vm1, %v1743_v22 }
  0x3d   : > { %1553 = vmatprep.mubr.msk.bf16.mxu1 %vm347_vm1, %v1744_v23  ;;  %1605 = vmatprep.mubr.msk.bf16.mxu0 %vm347_vm1, %v1745_v24 }
  0x44   : > { %1554 = vmatmul.mubr.msk.bf16.gmra.mrb[24].mxu1 %vm347_vm1, %v1746_v25  ;;  %1606 = vmatmul.mubr.msk.bf16.gmra.mrb[8].mxu0 %vm347_vm1, %v1747_v26 }
  0x45   : > { %1557 = vmatprep.mubr.msk.bf16.mxu1 %vm347_vm1, %v1748_v27  ;;  %1609 = vmatprep.mubr.msk.bf16.mxu0 %vm347_vm1, %v1749_v28 }
  0x4c   : > { %1558 = vmatmul.mubr.msk.bf16.gmra.mrb[28].mxu1 %vm347_vm1, %v1750_v29  ;;  %1610 = vmatmul.mubr.msk.bf16.gmra.mrb[12].mxu0 %vm347_vm1, %v1751_v30 }
  0x4d   : > { %1579 = vmatprep.mubr.msk.bf16.mxu1 %vm347_vm1, %v1735_v14  ;;  %1613 = vmatprep.mubr.msk.bf16.mxu0 %vm347_vm1, %v1752_v31 }
  0x54   : > { %1580 = vmatmul.mubr.msk.bf16.vlgmr.msra.gmra.mrb[16].mxu1 %vm347_vm1, %v1736_v15  ;;  %1614 = vmatmul.mubr.msk.bf16.gmra.mrb[16].mxu0 %vm347_vm1, %v1753_v32 }
  0x55   : > { %1583 = vmatprep.mubr.msk.bf16.mxu1 %vm347_vm1, %v1738_v17  ;;  %1617 = vmatprep.mubr.msk.bf16.mxu0 %vm347_vm1, %v1754_v33 }
  0x5c   : > { %1584 = vmatmul.mubr.msk.bf16.gmra.mrb[20].mxu1 %vm347_vm1, %v1740_v19  ;;  %1618 = vmatmul.mubr.msk.bf16.gmra.mrb[20].mxu0 %vm347_vm1, %v1755_v34 }
  0x5d   : > { %1587 = vmatprep.mubr.msk.bf16.mxu1 %vm347_vm1, %v1742_v21  ;;  %1621 = vmatprep.mubr.msk.bf16.mxu0 %vm347_vm1, %v1756_v35 }
  0x64   : > { %1588 = vmatmul.mubr.msk.bf16.gmra.mrb[24].mxu1 %vm347_vm1, %v1744_v23  ;;  %1622 = vmatmul.mubr.msk.bf16.gmra.mrb[24].mxu0 %vm347_vm1, %v1757_v36 }
  0x65   : > { %1591 = vmatprep.mubr.msk.bf16.mxu1 %vm347_vm1, %v1746_v25  ;;  %1625 = vmatprep.mubr.msk.bf16.mxu0 %vm347_vm1, %v1758_v37 }
  0x6c   : > { %1592 = vmatmul.mubr.msk.bf16.gmra.mrb[28].mxu1 %vm347_vm1, %v1748_v27  ;;  %1626 = vmatmul.mubr.msk.bf16.gmra.mrb[28].mxu0 %vm347_vm1, %v1759_v38 }
  0xe7   : > { %v1531_v39 = vpop.f32.mrb[0].mxu1 }
  0xe8   : > { %v434_v40 = vpop.f32.mrb[1].mxu1 }
  0xe9   : > { %v1532_v41 = vpop.f32.mrb[2].mxu1 }
  0xea   : > { %v437_v42 = vpop.f32.mrb[3].mxu1 }
  0xef   : > { %v1535_v43 = vpop.f32.mrb[4].mxu1 }
  0xf0   : > { %v450_v44 = vpop.f32.mrb[5].mxu1 }
  0xf1   : > { %v1536_v45 = vpop.f32.mrb[6].mxu1 }
  0xf2   : > { %v453_v46 = vpop.f32.mrb[7].mxu1 }
  0xf7   : > { %v1932_v47 = vpop.f32.mrb[8].mxu1 }
  0xf8   : > { %v1934_v48 = vpop.f32.mrb[9].mxu1 }
  0xf9   : > { %v1936_v49 = vpop.f32.mrb[10].mxu1 }
  0xfa   : > { %v1938_v50 = vpop.f32.mrb[11].mxu1 }
  0xff   : > { %v1940_v51 = vpop.f32.mrb[12].mxu1 }
 0x100   : > { %v1942_v52 = vpop.f32.mrb[13].mxu1 }
 0x101   : > { %v1944_v53 = vpop.f32.mrb[14].mxu1 }
 0x102   : > { %v1946_v54 = vpop.f32.mrb[15].mxu1 }
 0x107   : > { %v1599_v55 = vpop.f32.mrb[0].mxu0 }
 0x108   : > { %v1631_v57 = vadd.f32 %v1599_v55, %v1531_v39  ;;  %v943_v58 = vpop.f32.mrb[1].mxu0 }
 0x109   : > { %v1632_v60 = vadd.f32 %v943_v58, %v434_v40  ;;  %v1600_v61 = vpop.f32.mrb[2].mxu0 }
 0x10a   : > { %v1111_v62 = vmul.f32 %v1631_v57, %v1951_v56  ;;  %v1633_v63 = vadd.f32 %v1600_v61, %v1532_v41  ;;  %v946_v0 = vpop.f32.mrb[3].mxu0 }
 0x10b   : > { %v1109_v1 = vmul.f32 %v1632_v60, %v1951_v56  ;;  %v1634_v2 = vadd.f32 %v946_v0, %v437_v42 }
 0x10c   : > { %v1150_v3 = vadd.f32 %v1956_v59, %v1111_v62  ;;  %v1112_v4 = vmul.f32 %v1633_v63, %v1951_v56 }
 0x10d   : > { %v1148_v5 = vadd.f32 %v1956_v59, %v1109_v1  ;;  %v1110_v6 = vmul.f32 %v1634_v2, %v1951_v56 }
 0x10e   : > { %vm1182_vm2 = vcmp.ge.f32.partialorder %v1150_v3, 0.0  ;;  %v1214_v7 = vmul.f32 0.2, %v1150_v3  ;;  %v1151_v8 = vadd.f32 %v1956_v59, %v1112_v4 }
 0x10f   : > { %vm1180_vm3 = vcmp.ge.f32.partialorder %v1148_v5, 0.0  ;;  %v1212_v9 = vmul.f32 0.2, %v1148_v5  ;;  %v1149_v10 = vadd.f32 %v1956_v59, %v1110_v6  ;;  %v1603_v11 = vpop.f32.mrb[4].mxu0 }
 0x110   : > { %v1246_v12 = vsel %vm1182_vm2, %v1150_v3, %v1214_v7  ;;  %vm1183_vm4 = vcmp.ge.f32.partialorder %v1151_v8, 0.0  ;;  %v1215_v13 = vmul.f32 0.2, %v1151_v8  ;;  %v1635_v14 = vadd.f32 %v1603_v11, %v1535_v43  ;;  %v959_v15 = vpop.f32.mrb[5].mxu0 }
 0x111   : > { %1278 = vst [vmem:[%s1968_s10 + $0x10] sm:$0xff] %v1246_v12  ;;  %v1244_v16 = vsel %vm1180_vm3, %v1148_v5, %v1212_v9  ;;  %vm1181_vm5 = vcmp.ge.f32.partialorder %v1149_v10, 0.0  ;;  %v1213_v17 = vmul.f32 0.2, %v1149_v10  ;;  %v1636_v18 = vadd.f32 %v959_v15, %v450_v44  ;;  %v1604_v19 = vpop.f32.mrb[6].mxu0 }
 0x112   : > { %1276 = vst [vmem:[%s1968_s10] sm:$0xff] %v1244_v16  ;;  %v1247_v20 = vsel %vm1183_vm4, %v1151_v8, %v1215_v13  ;;  %v1115_v21 = vmul.f32 %v1635_v14, %v1951_v56  ;;  %v1637_v22 = vadd.f32 %v1604_v19, %v1536_v45  ;;  %v962_v23 = vpop.f32.mrb[7].mxu0 }
 0x113   : > { %1279 = vst [vmem:[%s1968_s10 + $0x18] sm:$0xff] %v1247_v20  ;;  %v1245_v24 = vsel %vm1181_vm5, %v1149_v10, %v1213_v17  ;;  %v1113_v25 = vmul.f32 %v1636_v18, %v1951_v56  ;;  %v1638_v26 = vadd.f32 %v962_v23, %v453_v46 }
 0x114   : > { %1277 = vst [vmem:[%s1968_s10 + $0x8] sm:$0xff] %v1245_v24  ;;  %v1154_v27 = vadd.f32 %v1956_v59, %v1115_v21  ;;  %v1116_v28 = vmul.f32 %v1637_v22, %v1951_v56 }
 0x115   : > { %v1152_v29 = vadd.f32 %v1956_v59, %v1113_v25  ;;  %v1114_v30 = vmul.f32 %v1638_v26, %v1951_v56 }
 0x116   : > { %vm1186_vm6 = vcmp.ge.f32.partialorder %v1154_v27, 0.0  ;;  %v1218_v31 = vmul.f32 0.2, %v1154_v27  ;;  %v1155_v32 = vadd.f32 %v1956_v59, %v1116_v28 }
 0x117   : > { %vm1184_vm7 = vcmp.ge.f32.partialorder %v1152_v29, 0.0  ;;  %v1216_v33 = vmul.f32 0.2, %v1152_v29  ;;  %v1153_v34 = vadd.f32 %v1956_v59, %v1114_v30  ;;  %v1607_v35 = vpop.f32.mrb[8].mxu0 }
 0x118   : > { %v1250_v36 = vsel %vm1186_vm6, %v1154_v27, %v1218_v31  ;;  %vm1187_vm8 = vcmp.ge.f32.partialorder %v1155_v32, 0.0  ;;  %v1219_v37 = vmul.f32 0.2, %v1155_v32  ;;  %v1639_v38 = vadd.f32 %v1607_v35, %v1932_v47  ;;  %v975_v39 = vpop.f32.mrb[9].mxu0 }
 0x119   : > { %1282 = vst [vmem:[%s1968_s10 + $0x30] sm:$0xff] %v1250_v36  ;;  %v1248_v40 = vsel %vm1184_vm7, %v1152_v29, %v1216_v33  ;;  %vm1185_vm9 = vcmp.ge.f32.partialorder %v1153_v34, 0.0  ;;  %v1217_v41 = vmul.f32 0.2, %v1153_v34  ;;  %v1640_v42 = vadd.f32 %v975_v39, %v1934_v48  ;;  %v1608_v43 = vpop.f32.mrb[10].mxu0 }
 0x11a   : > { %1280 = vst [vmem:[%s1968_s10 + $0x20] sm:$0xff] %v1248_v40  ;;  %v1251_v44 = vsel %vm1187_vm8, %v1155_v32, %v1219_v37  ;;  %v1119_v45 = vmul.f32 %v1639_v38, %v1951_v56  ;;  %v1641_v46 = vadd.f32 %v1608_v43, %v1936_v49  ;;  %v978_v55 = vpop.f32.mrb[11].mxu0 }
 0x11b   : > { %1283 = vst [vmem:[%s1968_s10 + $0x38] sm:$0xff] %v1251_v44  ;;  %v1249_v57 = vsel %vm1185_vm9, %v1153_v34, %v1217_v41  ;;  %v1117_v47 = vmul.f32 %v1640_v42, %v1951_v56  ;;  %v1642_v58 = vadd.f32 %v978_v55, %v1938_v50 }
 0x11c   : > { %1281 = vst [vmem:[%s1968_s10 + $0x28] sm:$0xff] %v1249_v57  ;;  %v1158_v60 = vadd.f32 %v1956_v59, %v1119_v45  ;;  %v1120_v48 = vmul.f32 %v1641_v46, %v1951_v56 }
 0x11d   : > { %v1156_v61 = vadd.f32 %v1956_v59, %v1117_v47  ;;  %v1118_v62 = vmul.f32 %v1642_v58, %v1951_v56 }
 0x11e   : > { %vm1190_vm10 = vcmp.ge.f32.partialorder %v1158_v60, 0.0  ;;  %v1222_v63 = vmul.f32 0.2, %v1158_v60  ;;  %v1159_v49 = vadd.f32 %v1956_v59, %v1120_v48 }
 0x11f   : > { %vm1188_vm11 = vcmp.ge.f32.partialorder %v1156_v61, 0.0  ;;  %v1220_v0 = vmul.f32 0.2, %v1156_v61  ;;  %v1157_v1 = vadd.f32 %v1956_v59, %v1118_v62  ;;  %v1611_v50 = vpop.f32.mrb[12].mxu0 }
 0x120   : > { %v1254_v2 = vsel %vm1190_vm10, %v1158_v60, %v1222_v63  ;;  %vm1191_vm12 = vcmp.ge.f32.partialorder %v1159_v49, 0.0  ;;  %v1223_v3 = vmul.f32 0.2, %v1159_v49  ;;  %v1643_v4 = vadd.f32 %v1611_v50, %v1940_v51  ;;  %v991_v5 = vpop.f32.mrb[13].mxu0 }
 0x121   : > { %1286 = vst [vmem:[%s1968_s10 + $0x50] sm:$0xff] %v1254_v2  ;;  %v1252_v6 = vsel %vm1188_vm11, %v1156_v61, %v1220_v0  ;;  %vm1189_vm13 = vcmp.ge.f32.partialorder %v1157_v1, 0.0  ;;  %v1221_v7 = vmul.f32 0.2, %v1157_v1  ;;  %v1644_v8 = vadd.f32 %v991_v5, %v1942_v52  ;;  %v1612_v9 = vpop.f32.mrb[14].mxu0 }
 0x122   : > { %1284 = vst [vmem:[%s1968_s10 + $0x40] sm:$0xff] %v1252_v6  ;;  %v1255_v10 = vsel %vm1191_vm12, %v1159_v49, %v1223_v3  ;;  %v1123_v11 = vmul.f32 %v1643_v4, %v1951_v56  ;;  %v1645_v12 = vadd.f32 %v1612_v9, %v1944_v53  ;;  %v994_v13 = vpop.f32.mrb[15].mxu0 }
 0x123   : > { %1287 = vst [vmem:[%s1968_s10 + $0x58] sm:$0xff] %v1255_v10  ;;  %v1253_v14 = vsel %vm1189_vm13, %v1157_v1, %v1221_v7  ;;  %v1121_v51 = vmul.f32 %v1644_v8, %v1951_v56  ;;  %v1646_v15 = vadd.f32 %v994_v13, %v1946_v54 }
 0x124   : > { %1285 = vst [vmem:[%s1968_s10 + $0x48] sm:$0xff] %v1253_v14  ;;  %v1162_v16 = vadd.f32 %v1956_v59, %v1123_v11  ;;  %v1124_v17 = vmul.f32 %v1645_v12, %v1951_v56 }
 0x125   : > { %v1160_v52 = vadd.f32 %v1956_v59, %v1121_v51  ;;  %v1122_v18 = vmul.f32 %v1646_v15, %v1951_v56 }
 0x126   : > { %vm1194_vm14 = vcmp.ge.f32.partialorder %v1162_v16, 0.0  ;;  %v1226_v19 = vmul.f32 0.2, %v1162_v16  ;;  %v1163_v53 = vadd.f32 %v1956_v59, %v1124_v17 }
 0x127   : > { %vm1192_vm15 = vcmp.ge.f32.partialorder %v1160_v52, 0.0  ;;  %v1224_v20 = vmul.f32 0.2, %v1160_v52  ;;  %v1161_v21 = vadd.f32 %v1956_v59, %v1122_v18  ;;  %v1581_v54 = vpop.f32.mrb[16].mxu1  ;;  %v1615_v22 = vpop.f32.mrb[16].mxu0 }
 0x128   : > { %v1258_v23 = vsel %vm1194_vm14, %v1162_v16, %v1226_v19  ;;  %vm1195_vm0 = vcmp.ge.f32.partialorder %v1163_v53, 0.0  ;;  %v1227_v24 = vmul.f32 0.2, %v1163_v53  ;;  %v1647_v25 = vadd.f32 %v1615_v22, %v1581_v54  ;;  %v675_v26 = vpop.f32.mrb[17].mxu1  ;;  %v1007_v27 = vpop.f32.mrb[17].mxu0 }
 0x129   : > { %1290 = vst [vmem:[%s1968_s10 + $0x70] sm:$0xff] %v1258_v23  ;;  %v1256_v28 = vsel %vm1192_vm15, %v1160_v52, %v1224_v20  ;;  %vm1193_vm1 = vcmp.ge.f32.partialorder %v1161_v21, 0.0  ;;  %v1225_v29 = vmul.f32 0.2, %v1161_v21  ;;  %v1648_v30 = vadd.f32 %v1007_v27, %v675_v26  ;;  %v1582_v31 = vpop.f32.mrb[18].mxu1  ;;  %v1616_v32 = vpop.f32.mrb[18].mxu0 }
 0x12a   : > { %1288 = vst [vmem:[%s1968_s10 + $0x60] sm:$0xff] %v1256_v28  ;;  %v1259_v33 = vsel %vm1195_vm0, %v1163_v53, %v1227_v24  ;;  %v1127_v34 = vmul.f32 %v1647_v25, %v1951_v56  ;;  %v1649_v35 = vadd.f32 %v1616_v32, %v1582_v31  ;;  %v678_v36 = vpop.f32.mrb[19].mxu1  ;;  %v1010_v37 = vpop.f32.mrb[19].mxu0 }
 0x12b   : > { %1291 = vst [vmem:[%s1968_s10 + $0x78] sm:$0xff] %v1259_v33  ;;  %v1257_v38 = vsel %vm1193_vm1, %v1161_v21, %v1225_v29  ;;  %v1125_v39 = vmul.f32 %v1648_v30, %v1951_v56  ;;  %v1650_v40 = vadd.f32 %v1010_v37, %v678_v36 }
 0x12c   : > { %1289 = vst [vmem:[%s1968_s10 + $0x68] sm:$0xff] %v1257_v38  ;;  %v1166_v41 = vadd.f32 %v1956_v59, %v1127_v34  ;;  %v1128_v42 = vmul.f32 %v1649_v35, %v1951_v56 }
 0x12d   : > { %v1164_v43 = vadd.f32 %v1956_v59, %v1125_v39  ;;  %v1126_v44 = vmul.f32 %v1650_v40, %v1951_v56 }
 0x12e   : > { %vm1198_vm2 = vcmp.ge.f32.partialorder %v1166_v41, 0.0  ;;  %v1230_v45 = vmul.f32 0.2, %v1166_v41  ;;  %v1167_v46 = vadd.f32 %v1956_v59, %v1128_v42 }
 0x12f   : > { %vm1196_vm3 = vcmp.ge.f32.partialorder %v1164_v43, 0.0  ;;  %v1228_v55 = vmul.f32 0.2, %v1164_v43  ;;  %v1165_v57 = vadd.f32 %v1956_v59, %v1126_v44  ;;  %v1585_v47 = vpop.f32.mrb[20].mxu1  ;;  %v1619_v58 = vpop.f32.mrb[20].mxu0 }
 0x130   : > { %v1262_v60 = vsel %vm1198_vm2, %v1166_v41, %v1230_v45  ;;  %vm1199_vm4 = vcmp.ge.f32.partialorder %v1167_v46, 0.0  ;;  %v1231_v48 = vmul.f32 0.2, %v1167_v46  ;;  %v1651_v61 = vadd.f32 %v1619_v58, %v1585_v47  ;;  %v691_v62 = vpop.f32.mrb[21].mxu1  ;;  %v1023_v63 = vpop.f32.mrb[21].mxu0 }
 0x131   : > { %1294 = vst [vmem:[%s1968_s10 + $0x90] sm:$0xff] %v1262_v60  ;;  %v1260_v49 = vsel %vm1196_vm3, %v1164_v43, %v1228_v55  ;;  %vm1197_vm5 = vcmp.ge.f32.partialorder %v1165_v57, 0.0  ;;  %v1229_v0 = vmul.f32 0.2, %v1165_v57  ;;  %v1652_v1 = vadd.f32 %v1023_v63, %v691_v62  ;;  %v1586_v50 = vpop.f32.mrb[22].mxu1  ;;  %v1620_v2 = vpop.f32.mrb[22].mxu0 }
 0x132   : > { %1292 = vst [vmem:[%s1968_s10 + $0x80] sm:$0xff] %v1260_v49  ;;  %v1263_v3 = vsel %vm1199_vm4, %v1167_v46, %v1231_v48  ;;  %v1131_v4 = vmul.f32 %v1651_v61, %v1951_v56  ;;  %v1653_v5 = vadd.f32 %v1620_v2, %v1586_v50  ;;  %v694_v6 = vpop.f32.mrb[23].mxu1  ;;  %v1026_v7 = vpop.f32.mrb[23].mxu0 }
 0x133   : > { %1295 = vst [vmem:[%s1968_s10 + $0x98] sm:$0xff] %v1263_v3  ;;  %v1261_v8 = vsel %vm1197_vm5, %v1165_v57, %v1229_v0  ;;  %v1129_v9 = vmul.f32 %v1652_v1, %v1951_v56  ;;  %v1654_v10 = vadd.f32 %v1026_v7, %v694_v6 }
 0x134   : > { %1293 = vst [vmem:[%s1968_s10 + $0x88] sm:$0xff] %v1261_v8  ;;  %v1170_v11 = vadd.f32 %v1956_v59, %v1131_v4  ;;  %v1132_v12 = vmul.f32 %v1653_v5, %v1951_v56 }
 0x135   : > { %v1168_v13 = vadd.f32 %v1956_v59, %v1129_v9  ;;  %v1130_v14 = vmul.f32 %v1654_v10, %v1951_v56 }
 0x136   : > { %vm1202_vm6 = vcmp.ge.f32.partialorder %v1170_v11, 0.0  ;;  %v1234_v51 = vmul.f32 0.2, %v1170_v11  ;;  %v1171_v15 = vadd.f32 %v1956_v59, %v1132_v12 }
 0x137   : > { %vm1200_vm7 = vcmp.ge.f32.partialorder %v1168_v13, 0.0  ;;  %v1232_v16 = vmul.f32 0.2, %v1168_v13  ;;  %v1169_v17 = vadd.f32 %v1956_v59, %v1130_v14  ;;  %v1589_v52 = vpop.f32.mrb[24].mxu1  ;;  %v1623_v18 = vpop.f32.mrb[24].mxu0 }
 0x138   : > { %v1266_v19 = vsel %vm1202_vm6, %v1170_v11, %v1234_v51  ;;  %vm1203_vm8 = vcmp.ge.f32.partialorder %v1171_v15, 0.0  ;;  %v1235_v53 = vmul.f32 0.2, %v1171_v15  ;;  %v1655_v20 = vadd.f32 %v1623_v18, %v1589_v52  ;;  %v707_v21 = vpop.f32.mrb[25].mxu1  ;;  %v1039_v54 = vpop.f32.mrb[25].mxu0 }
 0x139   : > { %1298 = vst [vmem:[%s1968_s10 + $0xb0] sm:$0xff] %v1266_v19  ;;  %v1264_v22 = vsel %vm1200_vm7, %v1168_v13, %v1232_v16  ;;  %vm1201_vm9 = vcmp.ge.f32.partialorder %v1169_v17, 0.0  ;;  %v1233_v23 = vmul.f32 0.2, %v1169_v17  ;;  %v1656_v24 = vadd.f32 %v1039_v54, %v707_v21  ;;  %v1590_v25 = vpop.f32.mrb[26].mxu1  ;;  %v1624_v26 = vpop.f32.mrb[26].mxu0 }
 0x13a   : > { %1296 = vst [vmem:[%s1968_s10 + $0xa0] sm:$0xff] %v1264_v22  ;;  %v1267_v27 = vsel %vm1203_vm8, %v1171_v15, %v1235_v53  ;;  %v1135_v28 = vmul.f32 %v1655_v20, %v1951_v56  ;;  %v1657_v29 = vadd.f32 %v1624_v26, %v1590_v25  ;;  %v710_v30 = vpop.f32.mrb[27].mxu1  ;;  %v1042_v31 = vpop.f32.mrb[27].mxu0 }
 0x13b   : > { %1299 = vst [vmem:[%s1968_s10 + $0xb8] sm:$0xff] %v1267_v27  ;;  %v1265_v32 = vsel %vm1201_vm9, %v1169_v17, %v1233_v23  ;;  %v1133_v33 = vmul.f32 %v1656_v24, %v1951_v56  ;;  %v1658_v34 = vadd.f32 %v1042_v31, %v710_v30 }
 0x13c   : > { %1297 = vst [vmem:[%s1968_s10 + $0xa8] sm:$0xff] %v1265_v32  ;;  %v1174_v35 = vadd.f32 %v1956_v59, %v1135_v28  ;;  %v1136_v36 = vmul.f32 %v1657_v29, %v1951_v56 }
 0x13d   : > { %v1172_v37 = vadd.f32 %v1956_v59, %v1133_v33  ;;  %v1134_v38 = vmul.f32 %v1658_v34, %v1951_v56 }
 0x13e   : > { %vm1206_vm10 = vcmp.ge.f32.partialorder %v1174_v35, 0.0  ;;  %v1238_v39 = vmul.f32 0.2, %v1174_v35  ;;  %v1175_v40 = vadd.f32 %v1956_v59, %v1136_v36 }
 0x13f   : > { %vm1204_vm11 = vcmp.ge.f32.partialorder %v1172_v37, 0.0  ;;  %v1236_v41 = vmul.f32 0.2, %v1172_v37  ;;  %v1173_v42 = vadd.f32 %v1956_v59, %v1134_v38  ;;  %v1593_v43 = vpop.f32.mrb[28].mxu1  ;;  %v1627_v44 = vpop.f32.mrb[28].mxu0 }
 0x140   : > { %v1270_v45 = vsel %vm1206_vm10, %v1174_v35, %v1238_v39  ;;  %vm1207_vm12 = vcmp.ge.f32.partialorder %v1175_v40, 0.0  ;;  %v1239_v46 = vmul.f32 0.2, %v1175_v40  ;;  %v1659_v55 = vadd.f32 %v1627_v44, %v1593_v43  ;;  %v723_v57 = vpop.f32.mrb[29].mxu1  ;;  %v1055_v47 = vpop.f32.mrb[29].mxu0 }
 0x141   : > { %1302 = vst [vmem:[%s1968_s10 + $0xd0] sm:$0xff] %v1270_v45  ;;  %v1268_v58 = vsel %vm1204_vm11, %v1172_v37, %v1236_v41  ;;  %vm1205_vm13 = vcmp.ge.f32.partialorder %v1173_v42, 0.0  ;;  %v1237_v60 = vmul.f32 0.2, %v1173_v42  ;;  %v1660_v48 = vadd.f32 %v1055_v47, %v723_v57  ;;  %v1594_v61 = vpop.f32.mrb[30].mxu1  ;;  %v1628_v62 = vpop.f32.mrb[30].mxu0 }
 0x142   : > { %1300 = vst [vmem:[%s1968_s10 + $0xc0] sm:$0xff] %v1268_v58  ;;  %v1271_v63 = vsel %vm1207_vm12, %v1175_v40, %v1239_v46  ;;  %v1139_v49 = vmul.f32 %v1659_v55, %v1951_v56  ;;  %v1661_v0 = vadd.f32 %v1628_v62, %v1594_v61  ;;  %v726_v1 = vpop.f32.mrb[31].mxu1  ;;  %v1058_v50 = vpop.f32.mrb[31].mxu0 }
 0x143   : > { %1303 = vst [vmem:[%s1968_s10 + $0xd8] sm:$0xff] %v1271_v63  ;;  %v1269_v2 = vsel %vm1205_vm13, %v1173_v42, %v1237_v60  ;;  %v1137_v3 = vmul.f32 %v1660_v48, %v1951_v56  ;;  %v1662_v4 = vadd.f32 %v1058_v50, %v726_v1 }
 0x144   : > { %1301 = vst [vmem:[%s1968_s10 + $0xc8] sm:$0xff] %v1269_v2  ;;  %v1178_v5 = vadd.f32 %v1956_v59, %v1139_v49  ;;  %v1140_v6 = vmul.f32 %v1661_v0, %v1951_v56 }
 0x145   : > { %v1176_v7 = vadd.f32 %v1956_v59, %v1137_v3  ;;  %v1138_v8 = vmul.f32 %v1662_v4, %v1951_v56 }
 0x146   : > { %vm1210_vm14 = vcmp.ge.f32.partialorder %v1178_v5, 0.0  ;;  %v1242_v9 = vmul.f32 0.2, %v1178_v5  ;;  %v1179_v10 = vadd.f32 %v1956_v59, %v1140_v6 }
 0x147   : > { %vm1208_vm15 = vcmp.ge.f32.partialorder %v1176_v7, 0.0  ;;  %v1240_v11 = vmul.f32 0.2, %v1176_v7  ;;  %v1177_v12 = vadd.f32 %v1956_v59, %v1138_v8 }
 0x148   : > { %v1274_v13 = vsel %vm1210_vm14, %v1178_v5, %v1242_v9  ;;  %vm1211_vm0 = vcmp.ge.f32.partialorder %v1179_v10, 0.0  ;;  %v1243_v14 = vmul.f32 0.2, %v1179_v10 }
 0x149   : > { %1306 = vst [vmem:[%s1968_s10 + $0xf0] sm:$0xff] %v1274_v13  ;;  %v1272_v51 = vsel %vm1208_vm15, %v1176_v7, %v1240_v11  ;;  %vm1209_vm1 = vcmp.ge.f32.partialorder %v1177_v12, 0.0  ;;  %v1241_v15 = vmul.f32 0.2, %v1177_v12 }
 0x14a   : > { %1304 = vst [vmem:[%s1968_s10 + $0xe0] sm:$0xff] %v1272_v51  ;;  %v1275_v16 = vsel %vm1211_vm0, %v1179_v10, %v1243_v14 }
 0x14b   : > { %1307 = vst [vmem:[%s1968_s10 + $0xf8] sm:$0xff] %v1275_v16  ;;  %v1273_v56 = vsel %vm1209_vm1, %v1177_v12, %v1241_v15 }
 0x14c   : > { %1305 = vst [vmem:[%s1968_s10 + $0xe8] sm:$0xff] %v1273_v56 }
 0x14d PF: > { %s14_s17 = sadd.s32 1, %s1782_s17   ;;  %s2082_s15 = smov %s1778_s16 }
 0x14e   : > { %p11_p5 = scmp.ge.s32.totalorder %s14_s17, 4   ;;  %s2083_s16 = smov %s2085_s18 }
 0x150   :  { %13 = sbr.rel (!%p11_p5) target bundleno = 2 (0x2), region = 68 }

</bundles_post_ra>
